<compile_context>
chip_gen: v6e
topology: v6e:2x2x1
jax: 0.10.0
libtpu: 0.0.40
codegen_flags: <defaults>
</compile_context>

<pallas_src>
import math

import jax
import jax.numpy as jnp
from jax.experimental import pallas as pl
from jax.experimental.pallas import tpu as pltpu

# ---------------- model hyper-params (small, deterministic) ----------------
B = 2
N = 16                      # sequence length (tokens)
C = 32                      # embedding_dim
NUM_HEADS = 4
HEAD_DIM = C // NUM_HEADS
MLP_RATIO = 4.0
HIDDEN = int(C * MLP_RATIO)
LN_EPS = 1e-5
SCALE = HEAD_DIM ** (-0.5)
SQRT2 = math.sqrt(2.0)
BN = B * N


def _gelu(x):
    # Exact (erf) GELU; erf via Abramowitz-Stegun 7.1.26 polynomial so we only
    # rely on exp / mul / add / where inside Mosaic.  |erf err| < 2e-7.
    z = x * (1.0 / SQRT2)
    az = jnp.abs(z)
    t = 1.0 / (1.0 + 0.3275911 * az)
    poly = ((((1.061405429 * t - 1.453152027) * t + 1.421413741) * t
             - 0.284496736) * t + 0.254829592) * t
    erf_abs = 1.0 - poly * jnp.exp(-az * az)
    erf_z = jnp.where(z >= 0.0, erf_abs, -erf_abs)
    return 0.5 * x * (1.0 + erf_z)


# ---------------------------- the Pallas kernel -----------------------------
def encoder_kernel(x_ref,                      # (BN, C)   f32
                   wqkv_ref, bqkv_ref,         # (C, 3C) bf16, (1, 3C) f32
                   bias_ref,                   # (BN, BN)  f32  block-diag batch mask
                   wproj_ref, bproj_ref,       # (C, C) bf16, (1, C) f32
                   w1_ref, b1_ref,             # (C, HID) bf16, (1, HID) f32
                   w2_ref, b2_ref,             # (HID, C) bf16, (1, C) f32
                   o_ref):                     # (BN, C)
    x = x_ref[...]                                                   # (BN, C) f32

    # ----- norm1 (affine folded into wqkv/bqkv in the wrapper) -----
    mu = jnp.mean(x, axis=-1, keepdims=True)
    var = jnp.mean((x - mu) ** 2, axis=-1, keepdims=True)
    xn = (x - mu) * jax.lax.rsqrt(var + LN_EPS)                      # (BN, C)

    # ----- QKV: one dense matmul (BN,C)@(C,3C), softmax scale folded into q -----
    qkv = jnp.dot(xn.astype(jnp.bfloat16), wqkv_ref[...],
                  preferred_element_type=jnp.float32) + bqkv_ref[...]      # (BN, 3C)

    # ----- split heads onto a leading batch axis (small static lane slices) -----
    def split_heads(base):
        return jnp.stack(
            [qkv[:, base + h * HEAD_DIM: base + (h + 1) * HEAD_DIM]
             for h in range(NUM_HEADS)], axis=0).astype(jnp.bfloat16)       # (H, BN, hd)

    qh = split_heads(0)
    kh = split_heads(C)
    vh = split_heads(2 * C)

    # ----- attention, batched over heads; additive block-diag bias keeps the
    #       two batch elements from attending to each other -----
    s = jnp.einsum('hqd,hkd->hqk', qh, kh,
                   preferred_element_type=jnp.float32)                      # (H, BN, BN)
    s = s + bias_ref[...]                                                   # broadcast over H
    s = s - jnp.max(s, axis=-1, keepdims=True)
    p = jnp.exp(s)
    p = p / jnp.sum(p, axis=-1, keepdims=True)          # exact reciprocal (free at this size)
    o_heads = jnp.einsum('hqk,hkd->hqd', p.astype(jnp.bfloat16), vh,
                         preferred_element_type=jnp.float32)                # (H, BN, hd)

    # ----- merge heads back onto lanes; single (BN,C)@(C,C) projection fuses the
    #       head reduction into the MXU (contraction depth 32) -----
    o_cat = jnp.concatenate([o_heads[h] for h in range(NUM_HEADS)], axis=-1)  # (BN, C)
    attn_out = jnp.dot(o_cat.astype(jnp.bfloat16), wproj_ref[...],
                       preferred_element_type=jnp.float32) + bproj_ref[...]
    x = x + attn_out                                                        # residual

    # ----- norm2 (affine folded into fc1) + MLP + residual -----
    mu2 = jnp.mean(x, axis=-1, keepdims=True)
    var2 = jnp.mean((x - mu2) ** 2, axis=-1, keepdims=True)
    xn2 = (x - mu2) * jax.lax.rsqrt(var2 + LN_EPS)

    h1 = jnp.dot(xn2.astype(jnp.bfloat16), w1_ref[...],
                 preferred_element_type=jnp.float32) + b1_ref[...]
    h1 = _gelu(h1)
    h2 = jnp.dot(h1.astype(jnp.bfloat16), w2_ref[...],
                 preferred_element_type=jnp.float32) + b2_ref[...]

    o_ref[...] = (x + h2).astype(o_ref.dtype)


# ------------------- one-time (cached) weight folding -----------------------
def fold_params(params):
    """Fold LN affines + softmax scale into the matmul weights and build the
    static attention bias.  Run ONCE and reuse the result (per perf review:
    keep per-step work to just the pallas_call)."""
    g1, be1 = params["g1"], params["be1"]
    g2, be2 = params["g2"], params["be2"]
    wqkv, bqkv = params["wqkv"], params["bqkv"]          # (C, 3C), (3C,)
    wproj, bproj = params["wproj"], params["bproj"]      # (C, C),  (C,)
    w1, b1 = params["w1"], params["bb1"]                 # (C, HID),(HID,)
    w2, b2 = params["w2"], params["bb2"]                 # (HID, C),(C,)

    # fold LN1 affine into the qkv projection
    wqkv_f = wqkv * g1[:, None]
    bqkv_f = bqkv + be1 @ wqkv
    # fold the softmax scale into the q block (first C columns)
    scale_cols = jnp.concatenate([jnp.full((C,), SCALE, jnp.float32),
                                  jnp.ones((2 * C,), jnp.float32)])
    wqkv_f = wqkv_f * scale_cols[None, :]
    bqkv_f = bqkv_f * scale_cols

    # fold LN2 affine into fc1
    w1_f = w1 * g2[:, None]
    b1_f = b1 + be2 @ w1

    # static block-diagonal additive bias: token (b, i) only attends to (b, j)
    tok = jnp.arange(BN)
    same = (tok[:, None] // N) == (tok[None, :] // N)
    attn_bias = jnp.where(same, 0.0, -1e9).astype(jnp.float32)            # (BN, BN)

    return (
        wqkv_f.astype(jnp.bfloat16),
        bqkv_f.reshape(1, 3 * C).astype(jnp.float32),
        attn_bias,
        wproj.astype(jnp.bfloat16),
        bproj.reshape(1, C).astype(jnp.float32),
        w1_f.astype(jnp.bfloat16),
        b1_f.reshape(1, HIDDEN).astype(jnp.float32),
        w2.astype(jnp.bfloat16),
        b2.reshape(1, C).astype(jnp.float32),
    )


# ------------------------------- wrapper ------------------------------------
@jax.jit
def transformer_self_encoder_layer(x, folded):
    """x: (B, N, C) float32. folded: output of fold_params (computed once)."""
    b, n, c = x.shape
    x2 = x.reshape(b * n, c)

    def whole(p):  # full-array block; index_map returns all-zeros block index
        return pl.BlockSpec(p.shape, lambda i, nd=p.ndim: (0,) * nd)

    in_specs = [whole(x2)] + [whole(p) for p in folded]

    grid_spec = pltpu.PrefetchScalarGridSpec(
        num_scalar_prefetch=0,
        grid=(1,),                                   # single block: whole tensor
        in_specs=in_specs,
        out_specs=pl.BlockSpec((b * n, c), lambda i: (0, 0)),
    )

    out = pl.pallas_call(
        encoder_kernel,
        out_shape=jax.ShapeDtypeStruct((b * n, c), x.dtype),
        grid_spec=grid_spec,
        compiler_params=pltpu.CompilerParams(dimension_semantics=("arbitrary",)),
    )(x2, *folded)
    return out.reshape(b, n, c)


# ----------------------- pure-JAX reference (check) --------------------------
def reference(x, params):
    def ln(z, g, be):
        mu = jnp.mean(z, axis=-1, keepdims=True)
        var = jnp.mean((z - mu) ** 2, axis=-1, keepdims=True)
        return (z - mu) / jnp.sqrt(var + LN_EPS) * g + be

    def gelu_exact(z):
        return 0.5 * z * (1.0 + jax.lax.erf(z / SQRT2))

    xn = ln(x, params["g1"], params["be1"])
    qkv = xn @ params["wqkv"] + params["bqkv"]                    # (B, N, 3C)
    q, k, v = jnp.split(qkv, 3, axis=-1)

    def heads(t):
        return t.reshape(B, N, NUM_HEADS, HEAD_DIM).transpose(0, 2, 1, 3)

    qh, kh, vh = heads(q), heads(k), heads(v)
    attn = jnp.einsum("bhqd,bhkd->bhqk", qh, kh) * SCALE
    attn = jax.nn.softmax(attn, axis=-1)
    out = jnp.einsum("bhqk,bhkd->bhqd", attn, vh)
    out = out.transpose(0, 2, 1, 3).reshape(B, N, C)
    out = out @ params["wproj"] + params["bproj"]
    x = x + out

    xn2 = ln(x, params["g2"], params["be2"])
    h1 = gelu_exact(xn2 @ params["w1"] + params["bb1"])
    h2 = h1 @ params["w2"] + params["bb2"]
    return x + h2


# --------------------------------- main --------------------------------------
if __name__ == "__main__":
    key = jax.random.PRNGKey(0)
    ks = jax.random.split(key, 16)

    def init(k, shape, scale=0.05):
        return jax.random.normal(k, shape, dtype=jnp.float32) * scale

    params = {
        # LayerNorm params (non-trivial, to exercise the affine folding)
        "g1": 1.0 + 0.1 * jax.random.normal(ks[9], (C,), dtype=jnp.float32),
        "be1": 0.05 * jax.random.normal(ks[10], (C,), dtype=jnp.float32),
        "g2": 1.0 + 0.1 * jax.random.normal(ks[11], (C,), dtype=jnp.float32),
        "be2": 0.05 * jax.random.normal(ks[12], (C,), dtype=jnp.float32),
        # qkv Linear (stored as (in, out) = W^T of PyTorch)
        "wqkv": init(ks[0], (C, 3 * C)),
        "bqkv": init(ks[1], (3 * C,)),
        # attention output projection
        "wproj": init(ks[2], (C, C)),
        "bproj": init(ks[3], (C,)),
        # MLP
        "w1": init(ks[4], (C, HIDDEN)),
        "bb1": init(ks[5], (HIDDEN,)),
        "w2": init(ks[6], (HIDDEN, C)),
        "bb2": init(ks[7], (C,)),
    }

    x = jax.random.normal(ks[8], (B, N, C), dtype=jnp.float32)

    # Fold weights ONCE (hoisted out of the per-step jitted call) and reuse.
    folded = jax.block_until_ready(fold_params(params))

    out = jax.block_until_ready(transformer_self_encoder_layer(x, folded))
    ref = jax.block_until_ready(reference(x, params))

    assert out.shape == (B, N, C)
    # bf16 matmul operands -> loosened tolerance vs f32 reference
    err = float(jnp.max(jnp.abs(out - ref)))
    assert jnp.allclose(out, ref, atol=2e-2, rtol=2e-2), err

    print("KERNEL_OK")
</pallas_src>

<mosaic_0001>
module attributes {stable_mosaic.version = 11 : i64} {
  func.func @encoder_kernel(%arg0: i32, %arg1: memref<32x32xf32, #tpu.memory_space<vmem>>, %arg2: memref<32x96xbf16, #tpu.memory_space<vmem>>, %arg3: memref<1x96xf32, #tpu.memory_space<vmem>>, %arg4: memref<32x32xf32, #tpu.memory_space<vmem>>, %arg5: memref<32x32xbf16, #tpu.memory_space<vmem>>, %arg6: memref<1x32xf32, #tpu.memory_space<vmem>>, %arg7: memref<32x128xbf16, #tpu.memory_space<vmem>>, %arg8: memref<1x128xf32, #tpu.memory_space<vmem>>, %arg9: memref<128x32xbf16, #tpu.memory_space<vmem>>, %arg10: memref<1x32xf32, #tpu.memory_space<vmem>>, %arg11: memref<32x32xf32, #tpu.memory_space<vmem>>) attributes {dimension_semantics = [#tpu.dimension_semantics<arbitrary>], iteration_bounds = array<i64: 1>, scalar_prefetch = 0 : i64, scratch_operands = 0 : i64, tpu.core_type = #tpu.core_type<tc>, window_params = [{pipeline_mode = #tpu.pipeline_mode<synchronous>, transform_indices = @transform_0, window_bounds = array<i64: 32, 32>}, {pipeline_mode = #tpu.pipeline_mode<synchronous>, transform_indices = @transform_1, window_bounds = array<i64: 32, 96>}, {pipeline_mode = #tpu.pipeline_mode<synchronous>, transform_indices = @transform_2, window_bounds = array<i64: 1, 96>}, {pipeline_mode = #tpu.pipeline_mode<synchronous>, transform_indices = @transform_3, window_bounds = array<i64: 32, 32>}, {pipeline_mode = #tpu.pipeline_mode<synchronous>, transform_indices = @transform_4, window_bounds = array<i64: 32, 32>}, {pipeline_mode = #tpu.pipeline_mode<synchronous>, transform_indices = @transform_5, window_bounds = array<i64: 1, 32>}, {pipeline_mode = #tpu.pipeline_mode<synchronous>, transform_indices = @transform_6, window_bounds = array<i64: 32, 128>}, {pipeline_mode = #tpu.pipeline_mode<synchronous>, transform_indices = @transform_7, window_bounds = array<i64: 1, 128>}, {pipeline_mode = #tpu.pipeline_mode<synchronous>, transform_indices = @transform_8, window_bounds = array<i64: 128, 32>}, {pipeline_mode = #tpu.pipeline_mode<synchronous>, transform_indices = @transform_9, window_bounds = array<i64: 1, 32>}, {pipeline_mode = #tpu.pipeline_mode<synchronous>, transform_indices = @transform_10, window_bounds = array<i64: 32, 32>}]} {
    %c0 = arith.constant 0 : index
    %c0_0 = arith.constant 0 : index
    %0 = vector.load %arg1[%c0, %c0_0] : memref<32x32xf32, #tpu.memory_space<vmem>>, vector<32x32xf32>
    %cst = arith.constant dense<0.000000e+00> : vector<32xf32>
    %1 = vector.multi_reduction <add>, %0, %cst [1] : vector<32x32xf32> to vector<32xf32>
    %2 = vector.shape_cast %1 : vector<32xf32> to vector<32x1xf32>
    %cst_1 = arith.constant 3.200000e+01 : f32
    %3 = vector.broadcast %cst_1 : f32 to vector<32x1xf32>
    %4 = arith.divf %2, %3 : vector<32x1xf32>
    %5 = vector.broadcast %4 : vector<32x1xf32> to vector<32x32xf32>
    %6 = arith.subf %0, %5 : vector<32x32xf32>
    %7 = arith.mulf %6, %6 : vector<32x32xf32>
    %cst_2 = arith.constant dense<0.000000e+00> : vector<32xf32>
    %8 = vector.multi_reduction <add>, %7, %cst_2 [1] : vector<32x32xf32> to vector<32xf32>
    %9 = vector.shape_cast %8 : vector<32xf32> to vector<32x1xf32>
    %cst_3 = arith.constant 3.200000e+01 : f32
    %10 = vector.broadcast %cst_3 : f32 to vector<32x1xf32>
    %11 = arith.divf %9, %10 : vector<32x1xf32>
    %12 = vector.broadcast %4 : vector<32x1xf32> to vector<32x32xf32>
    %13 = arith.subf %0, %12 : vector<32x32xf32>
    %cst_4 = arith.constant 9.99999974E-6 : f32
    %14 = vector.broadcast %cst_4 : f32 to vector<32x1xf32>
    %15 = arith.addf %11, %14 : vector<32x1xf32>
    %16 = math.rsqrt %15 : vector<32x1xf32>
    %17 = vector.broadcast %16 : vector<32x1xf32> to vector<32x32xf32>
    %18 = arith.mulf %13, %17 : vector<32x32xf32>
    %19 = arith.truncf %18 : vector<32x32xf32> to vector<32x32xbf16>
    %c0_5 = arith.constant 0 : index
    %c0_6 = arith.constant 0 : index
    %20 = vector.load %arg2[%c0_5, %c0_6] : memref<32x96xbf16, #tpu.memory_space<vmem>>, vector<32x96xbf16>
    %cst_7 = arith.constant dense<0.000000e+00> : vector<32x96xf32>
    %21 = tpu.matmul %19, %20, %cst_7 {dimension_numbers = #tpu.dot_dimension_numbers<[1], [0], [0], [1], [0, 0, 1, 1], [], []>} : vector<32x32xbf16>, vector<32x96xbf16>, vector<32x96xf32> -> vector<32x96xf32>
    %c0_8 = arith.constant 0 : index
    %c0_9 = arith.constant 0 : index
    %22 = vector.load %arg3[%c0_8, %c0_9] : memref<1x96xf32, #tpu.memory_space<vmem>>, vector<1x96xf32>
    %23 = vector.broadcast %22 : vector<1x96xf32> to vector<32x96xf32>
    %24 = arith.addf %21, %23 : vector<32x96xf32>
    %25 = vector.extract_strided_slice %24 {offsets = [0, 0], sizes = [32, 8], strides = [1, 1]} : vector<32x96xf32> to vector<32x8xf32>
    %26 = vector.extract_strided_slice %24 {offsets = [0, 8], sizes = [32, 8], strides = [1, 1]} : vector<32x96xf32> to vector<32x8xf32>
    %27 = vector.extract_strided_slice %24 {offsets = [0, 16], sizes = [32, 8], strides = [1, 1]} : vector<32x96xf32> to vector<32x8xf32>
    %28 = vector.extract_strided_slice %24 {offsets = [0, 24], sizes = [32, 8], strides = [1, 1]} : vector<32x96xf32> to vector<32x8xf32>
    %29 = vector.shape_cast %25 : vector<32x8xf32> to vector<1x32x8xf32>
    %30 = vector.shape_cast %26 : vector<32x8xf32> to vector<1x32x8xf32>
    %31 = vector.shape_cast %27 : vector<32x8xf32> to vector<1x32x8xf32>
    %32 = vector.shape_cast %28 : vector<32x8xf32> to vector<1x32x8xf32>
    %33 = tpu.concatenate %29, %30, %31, %32 in 0 : vector<1x32x8xf32>, vector<1x32x8xf32>, vector<1x32x8xf32>, vector<1x32x8xf32> -> vector<4x32x8xf32>
    %34 = arith.truncf %33 : vector<4x32x8xf32> to vector<4x32x8xbf16>
    %35 = vector.extract_strided_slice %24 {offsets = [0, 32], sizes = [32, 8], strides = [1, 1]} : vector<32x96xf32> to vector<32x8xf32>
    %36 = vector.extract_strided_slice %24 {offsets = [0, 40], sizes = [32, 8], strides = [1, 1]} : vector<32x96xf32> to vector<32x8xf32>
    %37 = vector.extract_strided_slice %24 {offsets = [0, 48], sizes = [32, 8], strides = [1, 1]} : vector<32x96xf32> to vector<32x8xf32>
    %38 = vector.extract_strided_slice %24 {offsets = [0, 56], sizes = [32, 8], strides = [1, 1]} : vector<32x96xf32> to vector<32x8xf32>
    %39 = vector.shape_cast %35 : vector<32x8xf32> to vector<1x32x8xf32>
    %40 = vector.shape_cast %36 : vector<32x8xf32> to vector<1x32x8xf32>
    %41 = vector.shape_cast %37 : vector<32x8xf32> to vector<1x32x8xf32>
    %42 = vector.shape_cast %38 : vector<32x8xf32> to vector<1x32x8xf32>
    %43 = tpu.concatenate %39, %40, %41, %42 in 0 : vector<1x32x8xf32>, vector<1x32x8xf32>, vector<1x32x8xf32>, vector<1x32x8xf32> -> vector<4x32x8xf32>
    %44 = arith.truncf %43 : vector<4x32x8xf32> to vector<4x32x8xbf16>
    %45 = vector.extract_strided_slice %24 {offsets = [0, 64], sizes = [32, 8], strides = [1, 1]} : vector<32x96xf32> to vector<32x8xf32>
    %46 = vector.extract_strided_slice %24 {offsets = [0, 72], sizes = [32, 8], strides = [1, 1]} : vector<32x96xf32> to vector<32x8xf32>
    %47 = vector.extract_strided_slice %24 {offsets = [0, 80], sizes = [32, 8], strides = [1, 1]} : vector<32x96xf32> to vector<32x8xf32>
    %48 = vector.extract_strided_slice %24 {offsets = [0, 88], sizes = [32, 8], strides = [1, 1]} : vector<32x96xf32> to vector<32x8xf32>
    %49 = vector.shape_cast %45 : vector<32x8xf32> to vector<1x32x8xf32>
    %50 = vector.shape_cast %46 : vector<32x8xf32> to vector<1x32x8xf32>
    %51 = vector.shape_cast %47 : vector<32x8xf32> to vector<1x32x8xf32>
    %52 = vector.shape_cast %48 : vector<32x8xf32> to vector<1x32x8xf32>
    %53 = tpu.concatenate %49, %50, %51, %52 in 0 : vector<1x32x8xf32>, vector<1x32x8xf32>, vector<1x32x8xf32>, vector<1x32x8xf32> -> vector<4x32x8xf32>
    %54 = arith.truncf %53 : vector<4x32x8xf32> to vector<4x32x8xbf16>
    "tpu.trace_start"() <{level = 10 : i32, message = "hqd,hkd->hqk"}> : () -> ()
    %cst_10 = arith.constant dense<0.000000e+00> : vector<4x32x32xf32>
    %55 = tpu.matmul %34, %44, %cst_10 {dimension_numbers = #tpu.dot_dimension_numbers<[2], [2], [1], [1], [0, 0, 0, 1, 1, 1], [0], [0]>} : vector<4x32x8xbf16>, vector<4x32x8xbf16>, vector<4x32x32xf32> -> vector<4x32x32xf32>
    "tpu.trace_stop"() : () -> ()
    %c0_11 = arith.constant 0 : index
    %c0_12 = arith.constant 0 : index
    %56 = vector.load %arg4[%c0_11, %c0_12] : memref<32x32xf32, #tpu.memory_space<vmem>>, vector<32x32xf32>
    %57 = vector.shape_cast %56 : vector<32x32xf32> to vector<1x32x32xf32>
    %58 = vector.broadcast %57 : vector<1x32x32xf32> to vector<4x32x32xf32>
    %59 = arith.addf %55, %58 : vector<4x32x32xf32>
    %cst_13 = arith.constant dense<0xFF800000> : vector<4x32xf32>
    %60 = vector.multi_reduction <maximumf>, %59, %cst_13 [2] : vector<4x32x32xf32> to vector<4x32xf32>
    %61 = vector.shape_cast %60 : vector<4x32xf32> to vector<4x32x1xf32>
    %62 = vector.broadcast %61 : vector<4x32x1xf32> to vector<4x32x32xf32>
    %63 = arith.subf %59, %62 : vector<4x32x32xf32>
    %64 = math.exp %63 : vector<4x32x32xf32>
    %cst_14 = arith.constant dense<0.000000e+00> : vector<4x32xf32>
    %65 = vector.multi_reduction <add>, %64, %cst_14 [2] : vector<4x32x32xf32> to vector<4x32xf32>
    %66 = vector.shape_cast %65 : vector<4x32xf32> to vector<4x32x1xf32>
    %67 = vector.broadcast %66 : vector<4x32x1xf32> to vector<4x32x32xf32>
    %68 = arith.divf %64, %67 : vector<4x32x32xf32>
    %69 = arith.truncf %68 : vector<4x32x32xf32> to vector<4x32x32xbf16>
    "tpu.trace_start"() <{level = 10 : i32, message = "hqk,hkd->hqd"}> : () -> ()
    %cst_15 = arith.constant dense<0.000000e+00> : vector<4x32x8xf32>
    %70 = tpu.matmul %69, %54, %cst_15 {dimension_numbers = #tpu.dot_dimension_numbers<[2], [1], [1], [2], [0, 0, 0, 1, 1, 2], [0], [0]>} : vector<4x32x32xbf16>, vector<4x32x8xbf16>, vector<4x32x8xf32> -> vector<4x32x8xf32>
    "tpu.trace_stop"() : () -> ()
    %71 = vector.extract_strided_slice %70 {offsets = [0, 0, 0], sizes = [1, 32, 8], strides = [1, 1, 1]} : vector<4x32x8xf32> to vector<1x32x8xf32>
    %72 = vector.shape_cast %71 : vector<1x32x8xf32> to vector<32x8xf32>
    %73 = vector.extract_strided_slice %70 {offsets = [1, 0, 0], sizes = [1, 32, 8], strides = [1, 1, 1]} : vector<4x32x8xf32> to vector<1x32x8xf32>
    %74 = vector.shape_cast %73 : vector<1x32x8xf32> to vector<32x8xf32>
    %75 = vector.extract_strided_slice %70 {offsets = [2, 0, 0], sizes = [1, 32, 8], strides = [1, 1, 1]} : vector<4x32x8xf32> to vector<1x32x8xf32>
    %76 = vector.shape_cast %75 : vector<1x32x8xf32> to vector<32x8xf32>
    %77 = vector.extract_strided_slice %70 {offsets = [3, 0, 0], sizes = [1, 32, 8], strides = [1, 1, 1]} : vector<4x32x8xf32> to vector<1x32x8xf32>
    %78 = vector.shape_cast %77 : vector<1x32x8xf32> to vector<32x8xf32>
    %79 = tpu.concatenate %72, %74, %76, %78 in 1 : vector<32x8xf32>, vector<32x8xf32>, vector<32x8xf32>, vector<32x8xf32> -> vector<32x32xf32>
    %80 = arith.truncf %79 : vector<32x32xf32> to vector<32x32xbf16>
    %c0_16 = arith.constant 0 : index
    %c0_17 = arith.constant 0 : index
    %81 = vector.load %arg5[%c0_16, %c0_17] : memref<32x32xbf16, #tpu.memory_space<vmem>>, vector<32x32xbf16>
    %cst_18 = arith.constant dense<0.000000e+00> : vector<32x32xf32>
    %82 = tpu.matmul %80, %81, %cst_18 {dimension_numbers = #tpu.dot_dimension_numbers<[1], [0], [0], [1], [0, 0, 1, 1], [], []>} : vector<32x32xbf16>, vector<32x32xbf16>, vector<32x32xf32> -> vector<32x32xf32>
    %c0_19 = arith.constant 0 : index
    %c0_20 = arith.constant 0 : index
    %83 = vector.load %arg6[%c0_19, %c0_20] : memref<1x32xf32, #tpu.memory_space<vmem>>, vector<1x32xf32>
    %84 = vector.broadcast %83 : vector<1x32xf32> to vector<32x32xf32>
    %85 = arith.addf %82, %84 : vector<32x32xf32>
    %86 = arith.addf %0, %85 : vector<32x32xf32>
    %cst_21 = arith.constant dense<0.000000e+00> : vector<32xf32>
    %87 = vector.multi_reduction <add>, %86, %cst_21 [1] : vector<32x32xf32> to vector<32xf32>
    %88 = vector.shape_cast %87 : vector<32xf32> to vector<32x1xf32>
    %cst_22 = arith.constant 3.200000e+01 : f32
    %89 = vector.broadcast %cst_22 : f32 to vector<32x1xf32>
    %90 = arith.divf %88, %89 : vector<32x1xf32>
    %91 = vector.broadcast %90 : vector<32x1xf32> to vector<32x32xf32>
    %92 = arith.subf %86, %91 : vector<32x32xf32>
    %93 = arith.mulf %92, %92 : vector<32x32xf32>
    %cst_23 = arith.constant dense<0.000000e+00> : vector<32xf32>
    %94 = vector.multi_reduction <add>, %93, %cst_23 [1] : vector<32x32xf32> to vector<32xf32>
    %95 = vector.shape_cast %94 : vector<32xf32> to vector<32x1xf32>
    %cst_24 = arith.constant 3.200000e+01 : f32
    %96 = vector.broadcast %cst_24 : f32 to vector<32x1xf32>
    %97 = arith.divf %95, %96 : vector<32x1xf32>
    %98 = vector.broadcast %90 : vector<32x1xf32> to vector<32x32xf32>
    %99 = arith.subf %86, %98 : vector<32x32xf32>
    %cst_25 = arith.constant 9.99999974E-6 : f32
    %100 = vector.broadcast %cst_25 : f32 to vector<32x1xf32>
    %101 = arith.addf %97, %100 : vector<32x1xf32>
    %102 = math.rsqrt %101 : vector<32x1xf32>
    %103 = vector.broadcast %102 : vector<32x1xf32> to vector<32x32xf32>
    %104 = arith.mulf %99, %103 : vector<32x32xf32>
    %105 = arith.truncf %104 : vector<32x32xf32> to vector<32x32xbf16>
    %c0_26 = arith.constant 0 : index
    %c0_27 = arith.constant 0 : index
    %106 = vector.load %arg7[%c0_26, %c0_27] : memref<32x128xbf16, #tpu.memory_space<vmem>>, vector<32x128xbf16>
    %cst_28 = arith.constant dense<0.000000e+00> : vector<32x128xf32>
    %107 = tpu.matmul %105, %106, %cst_28 {dimension_numbers = #tpu.dot_dimension_numbers<[1], [0], [0], [1], [0, 0, 1, 1], [], []>} : vector<32x32xbf16>, vector<32x128xbf16>, vector<32x128xf32> -> vector<32x128xf32>
    %c0_29 = arith.constant 0 : index
    %c0_30 = arith.constant 0 : index
    %108 = vector.load %arg8[%c0_29, %c0_30] : memref<1x128xf32, #tpu.memory_space<vmem>>, vector<1x128xf32>
    %109 = vector.broadcast %108 : vector<1x128xf32> to vector<32x128xf32>
    %110 = arith.addf %107, %109 : vector<32x128xf32>
    %cst_31 = arith.constant 0.707106769 : f32
    %111 = vector.broadcast %cst_31 : f32 to vector<32x128xf32>
    %112 = arith.mulf %110, %111 : vector<32x128xf32>
    %113 = math.absf %112 : vector<32x128xf32>
    %cst_32 = arith.constant 0.327591091 : f32
    %114 = vector.broadcast %cst_32 : f32 to vector<32x128xf32>
    %115 = arith.mulf %114, %113 : vector<32x128xf32>
    %cst_33 = arith.constant 1.000000e+00 : f32
    %116 = vector.broadcast %cst_33 : f32 to vector<32x128xf32>
    %117 = arith.addf %116, %115 : vector<32x128xf32>
    %cst_34 = arith.constant 1.000000e+00 : f32
    %118 = vector.broadcast %cst_34 : f32 to vector<32x128xf32>
    %119 = arith.divf %118, %117 : vector<32x128xf32>
    %cst_35 = arith.constant 1.06140542 : f32
    %120 = vector.broadcast %cst_35 : f32 to vector<32x128xf32>
    %121 = arith.mulf %120, %119 : vector<32x128xf32>
    %cst_36 = arith.constant 1.45315206 : f32
    %122 = vector.broadcast %cst_36 : f32 to vector<32x128xf32>
    %123 = arith.subf %121, %122 : vector<32x128xf32>
    %124 = arith.mulf %123, %119 : vector<32x128xf32>
    %cst_37 = arith.constant 1.42141378 : f32
    %125 = vector.broadcast %cst_37 : f32 to vector<32x128xf32>
    %126 = arith.addf %124, %125 : vector<32x128xf32>
    %127 = arith.mulf %126, %119 : vector<32x128xf32>
    %cst_38 = arith.constant 0.284496725 : f32
    %128 = vector.broadcast %cst_38 : f32 to vector<32x128xf32>
    %129 = arith.subf %127, %128 : vector<32x128xf32>
    %130 = arith.mulf %129, %119 : vector<32x128xf32>
    %cst_39 = arith.constant 0.254829586 : f32
    %131 = vector.broadcast %cst_39 : f32 to vector<32x128xf32>
    %132 = arith.addf %130, %131 : vector<32x128xf32>
    %133 = arith.mulf %132, %119 : vector<32x128xf32>
    %cst_40 = arith.constant 0.000000e+00 : f32
    %134 = vector.broadcast %cst_40 : f32 to vector<32x128xf32>
    %135 = arith.subf %134, %113 : vector<32x128xf32>
    %136 = arith.mulf %135, %113 : vector<32x128xf32>
    %137 = math.exp %136 : vector<32x128xf32>
    %138 = arith.mulf %133, %137 : vector<32x128xf32>
    %cst_41 = arith.constant 1.000000e+00 : f32
    %139 = vector.broadcast %cst_41 : f32 to vector<32x128xf32>
    %140 = arith.subf %139, %138 : vector<32x128xf32>
    %cst_42 = arith.constant 0.000000e+00 : f32
    %141 = vector.broadcast %cst_42 : f32 to vector<32x128xf32>
    %142 = arith.cmpf oge, %112, %141 : vector<32x128xf32>
    %cst_43 = arith.constant 0.000000e+00 : f32
    %143 = vector.broadcast %cst_43 : f32 to vector<32x128xf32>
    %144 = arith.subf %143, %140 : vector<32x128xf32>
    %145 = arith.select %142, %140, %144 : vector<32x128xi1>, vector<32x128xf32>
    %cst_44 = arith.constant 5.000000e-01 : f32
    %146 = vector.broadcast %cst_44 : f32 to vector<32x128xf32>
    %147 = arith.mulf %146, %110 : vector<32x128xf32>
    %cst_45 = arith.constant 1.000000e+00 : f32
    %148 = vector.broadcast %cst_45 : f32 to vector<32x128xf32>
    %149 = arith.addf %148, %145 : vector<32x128xf32>
    %150 = arith.mulf %147, %149 : vector<32x128xf32>
    %151 = arith.truncf %150 : vector<32x128xf32> to vector<32x128xbf16>
    %c0_46 = arith.constant 0 : index
    %c0_47 = arith.constant 0 : index
    %152 = vector.load %arg9[%c0_46, %c0_47] : memref<128x32xbf16, #tpu.memory_space<vmem>>, vector<128x32xbf16>
    %cst_48 = arith.constant dense<0.000000e+00> : vector<32x32xf32>
    %153 = tpu.matmul %151, %152, %cst_48 {dimension_numbers = #tpu.dot_dimension_numbers<[1], [0], [0], [1], [0, 0, 1, 1], [], []>} : vector<32x128xbf16>, vector<128x32xbf16>, vector<32x32xf32> -> vector<32x32xf32>
    %c0_49 = arith.constant 0 : index
    %c0_50 = arith.constant 0 : index
    %154 = vector.load %arg10[%c0_49, %c0_50] : memref<1x32xf32, #tpu.memory_space<vmem>>, vector<1x32xf32>
    %155 = vector.broadcast %154 : vector<1x32xf32> to vector<32x32xf32>
    %156 = arith.addf %153, %155 : vector<32x32xf32>
    %157 = arith.addf %86, %156 : vector<32x32xf32>
    %c0_51 = arith.constant 0 : index
    %c0_52 = arith.constant 0 : index
    %158 = vector.load %arg11[%c0_51, %c0_52] : memref<32x32xf32, #tpu.memory_space<vmem>>, vector<32x32xf32>
    tpu.vector_store %arg11[%c0_51, %c0_52], %157 {strides = array<i32>} : memref<32x32xf32, #tpu.memory_space<vmem>>, vector<32x32xf32>,
    return
  }
  func.func @transform_0(%arg0: i32) -> (i32, i32) {
    %c0_i32 = arith.constant 0 : i32
    %c0_i32_0 = arith.constant 0 : i32
    %c0_i32_1 = arith.constant 0 : i32
    return %c0_i32, %c0_i32_0 : i32, i32
  }
  func.func @transform_1(%arg0: i32) -> (i32, i32) {
    %c0_i32 = arith.constant 0 : i32
    %c0_i32_0 = arith.constant 0 : i32
    %c0_i32_1 = arith.constant 0 : i32
    return %c0_i32, %c0_i32_0 : i32, i32
  }
  func.func @transform_2(%arg0: i32) -> (i32, i32) {
    %c0_i32 = arith.constant 0 : i32
    %c0_i32_0 = arith.constant 0 : i32
    %c0_i32_1 = arith.constant 0 : i32
    return %c0_i32, %c0_i32_0 : i32, i32
  }
  func.func @transform_3(%arg0: i32) -> (i32, i32) {
    %c0_i32 = arith.constant 0 : i32
    %c0_i32_0 = arith.constant 0 : i32
    %c0_i32_1 = arith.constant 0 : i32
    return %c0_i32, %c0_i32_0 : i32, i32
  }
  func.func @transform_4(%arg0: i32) -> (i32, i32) {
    %c0_i32 = arith.constant 0 : i32
    %c0_i32_0 = arith.constant 0 : i32
    %c0_i32_1 = arith.constant 0 : i32
    return %c0_i32, %c0_i32_0 : i32, i32
  }
  func.func @transform_5(%arg0: i32) -> (i32, i32) {
    %c0_i32 = arith.constant 0 : i32
    %c0_i32_0 = arith.constant 0 : i32
    %c0_i32_1 = arith.constant 0 : i32
    return %c0_i32, %c0_i32_0 : i32, i32
  }
  func.func @transform_6(%arg0: i32) -> (i32, i32) {
    %c0_i32 = arith.constant 0 : i32
    %c0_i32_0 = arith.constant 0 : i32
    %c0_i32_1 = arith.constant 0 : i32
    return %c0_i32, %c0_i32_0 : i32, i32
  }
  func.func @transform_7(%arg0: i32) -> (i32, i32) {
    %c0_i32 = arith.constant 0 : i32
    %c0_i32_0 = arith.constant 0 : i32
    %c0_i32_1 = arith.constant 0 : i32
    return %c0_i32, %c0_i32_0 : i32, i32
  }
  func.func @transform_8(%arg0: i32) -> (i32, i32) {
    %c0_i32 = arith.constant 0 : i32
    %c0_i32_0 = arith.constant 0 : i32
    %c0_i32_1 = arith.constant 0 : i32
    return %c0_i32, %c0_i32_0 : i32, i32
  }
  func.func @transform_9(%arg0: i32) -> (i32, i32) {
    %c0_i32 = arith.constant 0 : i32
    %c0_i32_0 = arith.constant 0 : i32
    %c0_i32_1 = arith.constant 0 : i32
    return %c0_i32, %c0_i32_0 : i32, i32
  }
  func.func @transform_10(%arg0: i32) -> (i32, i32) {
    %c0_i32 = arith.constant 0 : i32
    %c0_i32_0 = arith.constant 0 : i32
    %c0_i32_1 = arith.constant 0 : i32
    return %c0_i32, %c0_i32_0 : i32, i32
  }
}

</mosaic_0001>

<bundles_post_ra>
// kernel: transformer_self_encoder_layer.1
= control target key start
LH: loop header
LB: loop body
LE: loop exit
PB: predicated region body
PF: predicated region fallthrough
CT: control target
= control target key end

     0   :  { %15 = vsyncpa [#allocation3], 0  ;;  %s2576_s0 = inlined_call_operand.vmem [shape: f32[32,32], index: 0, kind: input, shape index: {}]   ;;  %s2577_s1 = inlined_call_operand.vmem [shape: bf16[32,96], index: 1, kind: input, shape index: {}]   ;;  %s2578_s2 = inlined_call_operand.hbm [shape: f32[1,96], index: 2, kind: input, shape index: {}]   ;;  %s2579_s3 = inlined_call_operand.vmem [shape: f32[32,32], index: 3, kind: input, shape index: {}]   ;;  %s2580_s4 = inlined_call_operand.hbm [shape: bf16[32,32], index: 4, kind: input, shape index: {}]   ;;  %s2581_s5 = inlined_call_operand.hbm [shape: f32[1,32], index: 5, kind: input, shape index: {}]   ;;  %s2582_s6 = inlined_call_operand.hbm [shape: bf16[32,128], index: 6, kind: input, shape index: {}]   ;;  %s2583_s7 = inlined_call_operand.hbm [shape: f32[1,128], index: 7, kind: input, shape index: {}]   ;;  %s2584_s8 = inlined_call_operand.vmem [shape: bf16[128,32], index: 8, kind: input, shape index: {}]   ;;  %s2585_s9 = inlined_call_operand.vmem [shape: f32[1,32], index: 9, kind: input, shape index: {}]   ;;  %s2586_s10 = inlined_call_operand.hbm [shape: f32[32,32], index: 10, kind: output, shape index: {}]  }
   0x1   :  { %16 = vsyncpa [#allocation6], 0 }
   0x2   :  { %17 = vsyncpa [#allocation9], 0 }
   0x3   :  { %18 = vsyncpa [#allocation4], 0  ;;  %s2057_s13 = smov [#allocation5]  }
   0x4   :  { %s40_s14 = sshll.u32 %s2057_s13, 4  ;;  %s41_s14 = int_to_ptr.vmem [resolvable:$true] %s40_s14 }
   0x5   :  { %s1937_s15 = scalar_lea.vmem %s41_s14, 256  ;;  %p1942_p1 = scmp.lt.s32.totalorder %s41_s14, %s41_s14 }
   0x6   :  { %p1938_p0 = scmp.ne.s32.totalorder %s41_s14, %s1937_s15  ;;  %p1943_p2 = scmp.lt.s32.totalorder %s1937_s15, %s1937_s15 }
   0x8   :  { %p1944_p3 = por %p1943_p2, %p1942_p1 }
   0xa   :  { %p1945_p4 = pnand %p1944_p3, %p1938_p0 }
   0xc   :  { %1948 = shalt.err (!%p1945_p4)
}
   0xd   :  { %s2058_s16 = smov 64   ;;  %s2059_s17 = smov 4  }
   0xe   :  { %46 = dma.hbm_to_vmem [thread:$0]  %s2580_s4, 256, %s41_s14, [#allocation6], %s2058_s16, %s2058_s16, %s2059_s17  }
   0xf   :  { %s2060_s20 = smov [#allocation8]   ;;  %s2061_s22 = smov [#allocation2]  }
  0x10   :  { %s62_s21 = sshll.u32 %s2060_s20, 4  ;;  %s29_s23 = sshll.u32 %s2061_s22, 4  ;;  %s63_s21 = int_to_ptr.vmem [resolvable:$true] %s62_s21  ;;  %s30_s23 = int_to_ptr.vmem [resolvable:$true] %s29_s23 }
  0x11   :  { %s1957_s24 = scalar_lea.vmem %s63_s21, 256  ;;  %p1962_p6 = scmp.lt.s32.totalorder %s63_s21, %s63_s21 }
  0x12   :  { %p1958_p5 = scmp.ne.s32.totalorder %s63_s21, %s1957_s24  ;;  %p1963_p7 = scmp.lt.s32.totalorder %s1957_s24, %s1957_s24 }
  0x14   :  { %p1964_p8 = por %p1963_p7, %p1962_p6 }
  0x16   :  { %p1965_p9 = pnand %p1964_p8, %p1958_p5 }
  0x18   :  { %1968 = shalt.err (!%p1965_p9)
}
  0x19   :  { %68 = dma.hbm_to_vmem [thread:$0]  %s2582_s6, 256, %s63_s21, [#allocation9], %s2058_s16, %s2058_s16, %s2059_s17  }
  0x1a   :  { %s1977_s4 = scalar_lea.vmem %s30_s23, 16  ;;  %s1981_s27 = scalar_lea.vmem %s30_s23, 32 }
  0x1b   :  { %p1978_p10 = scmp.ne.s32.totalorder %s30_s23, %s1977_s4  ;;  %p1982_p11 = scmp.lt.s32.totalorder %s30_s23, %s30_s23 }
  0x1c   :  { %p1983_p12 = scmp.lt.s32.totalorder %s1981_s27, %s1977_s4 }
  0x1e   :  { %p1984_p13 = por %p1983_p12, %p1982_p11 }
  0x20   :  { %p1985_p0 = pnand %p1984_p13, %p1978_p10 }
  0x22   :  { %1988 = shalt.err (!%p1985_p0)
}
  0x23   :  { %32 = dma.hbm_to_vmem [thread:$0]  %s2578_s2, 16, %s30_s23, [#allocation3]  }
  0x24   :  { %s2062_s30 = smov [#allocation7]   ;;  %s2063_s12 = smov [#allocation10]  }
  0x25   :  { %s53_s11 = sshll.u32 %s2062_s30, 4  ;;  %s75_s13 = sshll.u32 %s2063_s12, 4  ;;  %s54_s11 = int_to_ptr.vmem [resolvable:$true] %s53_s11  ;;  %s76_s13 = int_to_ptr.vmem [resolvable:$true] %s75_s13 }
  0x26   :  { %s1997_s14 = scalar_lea.vmem %s54_s11, 16  ;;  %s2001_s6 = scalar_lea.vmem %s54_s11, 32 }
  0x27   :  { %p1998_p1 = scmp.ne.s32.totalorder %s54_s11, %s1997_s14  ;;  %p2002_p2 = scmp.lt.s32.totalorder %s54_s11, %s54_s11 }
  0x28   :  { %p2003_p3 = scmp.lt.s32.totalorder %s2001_s6, %s1997_s14 }
  0x2a   :  { %p2004_p4 = por %p2003_p3, %p2002_p2 }
  0x2c   :  { %p2005_p5 = pnand %p2004_p4, %p1998_p1 }
  0x2e   :  { %2008 = shalt.err (!%p2005_p5)
}
  0x2f   :  { %56 = dma.hbm_to_vmem [thread:$0]  %s2581_s5, 16, %s54_s11, [#allocation6]  }
  0x30   :  { %s2017_s18 = scalar_lea.vmem %s76_s13, 16  ;;  %s2021_s2 = scalar_lea.vmem %s76_s13, 32 }
  0x31   :  { %p2018_p6 = scmp.ne.s32.totalorder %s76_s13, %s2017_s18  ;;  %p2022_p7 = scmp.lt.s32.totalorder %s76_s13, %s76_s13 }
  0x32   :  { %p2023_p8 = scmp.lt.s32.totalorder %s2021_s2, %s2017_s18 }
  0x34   :  { %p2024_p9 = por %p2023_p8, %p2022_p7 }
  0x36   :  { %p2025_p10 = pnand %p2024_p9, %p2018_p6 }
  0x38   :  { %2028 = shalt.err (!%p2025_p10)
}
  0x39   :  { %78 = dma.hbm_to_vmem [thread:$0]  %s2583_s7, 16, %s76_s13, [#allocation9]  }
  0x3a   :  { %2049 = dma.done.wait [#allocation3], 16  }
  0x3b   :  { %2050 = vsyncadd [#allocation3], 4294967280 }
  0x3c   :  { %2051 = dma.done.wait [#allocation6], 272  }
  0x3d   :  { %2052 = vsyncadd [#allocation6], 4294967024 }
  0x3e   :  { %2053 = dma.done.wait [#allocation9], 272  }
  0x3f   :  { %2054 = vsyncadd [#allocation9], 4294967024  ;;  %vm103_vm0 = vcmask 261120   ;;  %v99_v0 = vld [vmem:[%s2576_s0] sm:$0xff]  ;;  %v101_v1 = vld [vmem:[%s2576_s0 + $0x10] sm:$0xff]  ;;  %vm295_vm1 = vcmask 64512  }
  0x40   :  { %v100_v2 = vld [vmem:[%s2576_s0 + $0x8] sm:$0xff]  ;;  %v104_v3 = vsel %vm103_vm0, %v99_v0, 0.0  ;;  %v110_v4 = vsel %vm103_vm0, %v101_v1, 0.0  ;;  %v102_v5 = vld [vmem:[%s2576_s0 + $0x18] sm:$0xff]  ;;  %v1816_v29 = vld [vmem:[%s2577_s1] sm:$0xff]   ;;  %s2065_s30 = smov 112  }
  0x41   :  { %105 = vadd.xlane.f32.xlu0 %v104_v3  ;;  %111 = vadd.xlane.f32.xlu1 %v110_v4  ;;  %v107_v6 = vsel %vm103_vm0, %v100_v2, 0.0  ;;  %v113_v7 = vsel %vm103_vm0, %v102_v5, 0.0  ;;  %v1815_v28 = vld [vmem:[%s2577_s1 + $0x8] sm:$0xff]   ;;  %v1521_v53 = vld [vmem:[#allocation2] ss:$0 sm:$0xff]  ;;  %s2064_s1 = smov 120  }
  0x42   :  { %1623 = vmatprep.subr.bf16.mxu0 %v1815_v28  ;;  %s2066_s11 = smov 96   ;;  %s2067_s12 = smov 104   ;;  %vm1038_vm2 = vcmask 130048   ;;  %vm1043_vm3 = vcmask 195584  }
  0x43   :  { %1624 = vmatpush3.bf16.msra.mxu0 %v1815_v28  ;;  %s2070_s20 = smov 24  }
  0x44   :  { %1625 = vmatprep.subr.bf16.mxu0 %v1816_v29 }
  0x45   :  { %108 = vadd.xlane.f32.xlu0 %v107_v6  ;;  %114 = vadd.xlane.f32.xlu1 %v113_v7 }
  0x47   :  { %1626 = vmatpush3.bf16.msra.mxu0 %v1816_v29 }
  0xca   :  { %v106_v8 = vpop.xlane.xlu0 %105  ;;  %v112_v9 = vpop.xlane.xlu1 %111 }
  0xcb   :  { %v117_v10 = vmul.f32 0.03125, %v106_v8  ;;  %v119_v11 = vmul.f32 0.03125, %v112_v9 }
  0xcd   :  { %v121_v12 = vsub.f32 %v99_v0, %v117_v10  ;;  %v123_v13 = vsub.f32 %v101_v1, %v119_v11 }
  0xce   :  { %v109_v14 = vpop.xlane.xlu0 %108  ;;  %v115_v15 = vpop.xlane.xlu1 %114 }
  0xcf   :  { %v118_v16 = vmul.f32 0.03125, %v109_v14  ;;  %v120_v17 = vmul.f32 0.03125, %v115_v15  ;;  %v125_v18 = vmul.f32 %v121_v12, %v121_v12  ;;  %v127_v19 = vmul.f32 %v123_v13, %v123_v13 }
  0xd1   :  { %v122_v20 = vsub.f32 %v100_v2, %v118_v16  ;;  %v124_v21 = vsub.f32 %v102_v5, %v120_v17  ;;  %v129_v22 = vsel %vm103_vm0, %v125_v18, 0.0  ;;  %v135_v23 = vsel %vm103_vm0, %v127_v19, 0.0 }
  0xd2   :  { %130 = vadd.xlane.f32.xlu0 %v129_v22 }
  0xd3   :  { %v126_v24 = vmul.f32 %v122_v20, %v122_v20  ;;  %v128_v25 = vmul.f32 %v124_v21, %v124_v21 }
  0xd5   :  { %v132_v26 = vsel %vm103_vm0, %v126_v24, 0.0  ;;  %v138_v27 = vsel %vm103_vm0, %v128_v25, 0.0 }
  0xd6   :  { %136 = vadd.xlane.f32.xlu0 %v135_v23  ;;  %133 = vadd.xlane.f32.xlu1 %v132_v26 }
  0xda   :  { %139 = vadd.xlane.f32.xlu1 %v138_v27 }
 0x15b   :  { %v131_v30 = vpop.xlane.xlu0 %130 }
 0x15c   :  { %v141_v31 = vmul.f32 0.03125, %v131_v30 }
 0x15e   :  { %v145_v32 = vadd.f32 1e-05, %v141_v31 }
 0x15f   :  { %v134_v33 = vpop.xlane.xlu1 %133  ;;  %v137_v34 = vpop.xlane.xlu0 %136 }
 0x160   :  { %v142_v35 = vmul.f32 0.03125, %v134_v33  ;;  %v143_v36 = vmul.f32 0.03125, %v137_v34  ;;  %1829 = vrsqrt.f32 %v145_v32 }
 0x162   :  { %v146_v37 = vadd.f32 1e-05, %v142_v35  ;;  %v147_v38 = vadd.f32 1e-05, %v143_v36 }
 0x163   :  { %v140_v39 = vpop.xlane.xlu1 %139 }
 0x164   :  { %1831 = vrsqrt.f32 %v146_v37  ;;  %v144_v40 = vmul.f32 0.03125, %v140_v39 }
 0x165   :  { %1833 = vrsqrt.f32 %v147_v38 }
 0x166   :  { %v148_v41 = vadd.f32 1e-05, %v144_v40 }
 0x168   :  { %1835 = vrsqrt.f32 %v148_v41  ;;  %v287_v41 = vld [vmem:[%s2579_s3 + $0x10] sm:$0xff] }
 0x16d   :  { %v1830_v42 = vpop.eup %1829 }
 0x16e   :  { %v153_v44 = vmul.f32 %v1830_v42, %v121_v12 }
 0x171   :  { %v1832_v43 = vpop.eup %1831 }
 0x172   :  { %v154_v45 = vmul.f32 %v1832_v43, %v122_v20  ;;  %v1834_v46 = vpop.eup %1833  ;;  %v285_v43 = vld [vmem:[%s2579_s3] sm:$0xff] }
 0x173   :  { %v155_v49 = vmul.f32 %v1834_v46, %v123_v13 }
 0x174   :  { %v157_v47 = vpack.c.bf16 %v154_v45, %v153_v44 }
 0x175   :  { %v1836_v48 = vpop.eup %1835 }
 0x176   :  { %1627 = vmatprep.mubr.msk.bf16.mxu0 %vm103_vm0, %v157_v47  ;;  %v156_v50 = vmul.f32 %v1836_v48, %v124_v21  ;;  %v2254_v48 = vld [vmem:[%s2579_s3 + $0x18] sm:$0xff] }
 0x178   :  { %v158_v51 = vpack.c.bf16 %v156_v50, %v155_v49  ;;  %v2259_v50 = vld [vmem:[%s2579_s3 + $0x8] sm:$0xff]  ;;  %s2068_s3 = smov 8  }
 0x17a   :  { %1628 = vmatmul.mubr.msk.bf16.vlgmr.msra.gmra.mxu0 %vm103_vm0, %v158_v51 }
 0x23a   :  { %v1629_v52 = vpop.f32.mrf.mxu0 }
 0x23b   :  { %v231_v56 = vadd.f32 %v1629_v52, %v1521_v53 }
 0x23c   :  { %v222_v54 = vpop.f32.mrf.mxu0 }
 0x23d   :  { %v223_v59 = vadd.f32 %v1521_v53, %v222_v54 }
 0x23e   :  { %v1630_v55 = vpop.f32.mrf.mxu0 }
 0x23f   :  { %v234_v57 = vadd.f32 %v1630_v55, %v1521_v53 }
 0x240   :  { %v225_v58 = vpop.f32.mrf.mxu0 }
 0x241   :  { %v226_v60 = vadd.f32 %v1521_v53, %v225_v58  ;;  %v1755_v61 = vpack.i.bf16 %v234_v57, %v231_v56  ;;  %v2179_v0 = vpack.c.bf16 %v234_v57, %v231_v56 }
 0x243   :  { %1756 = vrot.lane.b32.xlu0 %v1755_v61, %s2064_s1  ;;  %v1760_v62 = vpack.i.bf16 %v226_v60, %v223_v59  ;;  %v2175_v63 = vpack.c.bf16 %v226_v60, %v223_v59 }
 0x245   :  { %1761 = vrot.lane.b32.xlu1 %v1760_v62, %s2064_s1  ;;  %1635 = vmatprep.mubr.msk.bf16.mxu0 %vm295_vm1, %v2175_v63 }
 0x247   :  { %1776 = vrot.lane.b32.xlu0 %v1760_v62, %s2065_s30 }
 0x249   :  { %1766 = vrot.lane.b32.xlu1 %v1755_v61, %s2065_s30 }
 0x24b   :  { %293 = vrot.lane.b32.xlu0 %v2179_v0, %s2066_s11 }
 0x24d   :  { %1771 = vrot.lane.b32.xlu1 %v1755_v61, %s2067_s12 }
 0x251   :  { %1781 = vrot.lane.b32.xlu1 %v1760_v62, %s2067_s12 }
 0x255   :  { %291 = vrot.lane.b32.xlu1 %v2175_v63, %s2066_s11 }
 0x2b5   :  { %v1757_v1 = vpop.permute.xlu0 %1756 }
 0x2b6   :  { %v1759_v2 = vunpack.i.h.bf16 %v1757_v1  ;;  %v1758_v3 = vunpack.i.l.bf16 %v1757_v1 }
 0x2b7   :  { %v1762_v4 = vpop.permute.xlu1 %1761 }
 0x2b8   :  { %v2185_v5 = vpack.c.bf16 %v1759_v2, %v1758_v3  ;;  %v1764_v6 = vunpack.i.h.bf16 %v1762_v4  ;;  %v1763_v7 = vunpack.i.l.bf16 %v1762_v4 }
 0x2b9   :  { %v1777_v8 = vpop.permute.xlu0 %1776 }
 0x2ba   :  { %v2187_v9 = vpack.c.bf16 %v1764_v6, %v1763_v7  ;;  %v1779_v10 = vunpack.i.h.bf16 %v1777_v8  ;;  %v1778_v11 = vunpack.i.l.bf16 %v1777_v8  ;;  %361 = vrot.lane.b32.xlu0 %v2185_v5, %s2066_s11 }
 0x2bb   :  { %v1767_v12 = vpop.permute.xlu1 %1766 }
 0x2bc   :  { %v2191_v13 = vpack.c.bf16 %v1779_v10, %v1778_v11  ;;  %v1769_v14 = vunpack.i.h.bf16 %v1767_v12  ;;  %v1768_v15 = vunpack.i.l.bf16 %v1767_v12  ;;  %359 = vrot.lane.b32.xlu1 %v2187_v9, %s2066_s11 }
 0x2bd   :  { %v294_v16 = vpop.permute.xlu0 %293 }
 0x2be   :  { %v2195_v17 = vpack.c.bf16 %v1769_v14, %v1768_v15  ;;  %v306_v18 = vsel %vm295_vm1, %v294_v16, 0  ;;  %1731 = vmatprep.subr.msk.bf16.mxu0 %vm295_vm1, %v294_v16  ;;  %1651 = vmatprep.mubr.msk.bf16.mxu1 %vm295_vm1, %v2191_v13 }
 0x2bf   :  { %1632 = vmatpush3.bf16.xpose.msra.mxu0 %v306_v18  ;;  %v1772_v19 = vpop.permute.xlu1 %1771 }
 0x2c0   :  { %v1774_v20 = vunpack.i.h.bf16 %v1772_v19  ;;  %v1773_v21 = vunpack.i.l.bf16 %v1772_v19  ;;  %428 = vrot.lane.b32.xlu0 %v2195_v17, %s2066_s11 }
 0x2c2   :  { %v2203_v22 = vpack.c.bf16 %v1774_v20, %v1773_v21 }
 0x2c3   :  { %v1782_v23 = vpop.permute.xlu1 %1781 }
 0x2c4   :  { %v1784_v24 = vunpack.i.h.bf16 %v1782_v23  ;;  %v1783_v25 = vunpack.i.l.bf16 %v1782_v23  ;;  %426 = vrot.lane.b32.xlu0 %v2191_v13, %s2066_s11  ;;  %495 = vrot.lane.b32.xlu1 %v2203_v22, %s2066_s11 }
 0x2c6   :  { %v2209_v26 = vpack.c.bf16 %v1784_v24, %v1783_v25 }
 0x2c7   :  { %v292_v27 = vpop.permute.xlu1 %291 }
 0x2c8   :  { %v303_v28 = vsel %vm295_vm1, %v292_v27, 0  ;;  %493 = vrot.lane.b32.xlu1 %v2209_v26, %s2066_s11  ;;  %1732 = vmatprep.subr.msk.bf16.mxu0 %vm295_vm1, %v292_v27 }
 0x2c9   :  { %1634 = vmatpush3.bf16.xpose.msra.mxu0 %v303_v28 }
 0x2d0   :  { %1636 = vmatmul.mubr.msk.bf16.vlgmr.msra.gmra.mxu0 %vm295_vm1, %v2179_v0 }
 0x2d1   :  { %1643 = vmatprep.mubr.msk.bf16.mxu0 %vm295_vm1, %v2187_v9 }
 0x32c   :  { %v362_v29 = vpop.permute.xlu0 %361 }
 0x32d   :  { %v373_v30 = vsel %vm295_vm1, %v362_v29, 0  ;;  %1733 = vmatprep.subr.msk.bf16.mxu0 %vm295_vm1, %v362_v29 }
 0x32e   :  { %v360_v31 = vpop.permute.xlu1 %359  ;;  %1640 = vmatpush3.bf16.xpose.msra.mxu0 %v373_v30 }
 0x32f   :  { %1734 = vmatprep.subr.msk.bf16.mxu0 %vm295_vm1, %v360_v31  ;;  %v370_v34 = vsel %vm295_vm1, %v360_v31, 0 }
 0x332   :  { %v429_v32 = vpop.permute.xlu0 %428 }
 0x333   :  { %1735 = vmatprep.subr.msk.bf16.mxu1 %vm295_vm1, %v429_v32  ;;  %v440_v33 = vsel %vm295_vm1, %v429_v32, 0 }
 0x334   :  { %1648 = vmatpush3.bf16.xpose.msra.mxu1 %v440_v33 }
 0x336   :  { %v427_v35 = vpop.permute.xlu0 %426  ;;  %v496_v36 = vpop.permute.xlu1 %495  ;;  %1642 = vmatpush3.bf16.xpose.msra.mxu0 %v370_v34 }
 0x337   :  { %1736 = vmatprep.subr.msk.bf16.mxu1 %vm295_vm1, %v427_v35  ;;  %1737 = vmatprep.subr.msk.bf16.mxu0 %vm295_vm1, %v496_v36  ;;  %v437_v37 = vsel %vm295_vm1, %v427_v35, 0  ;;  %v507_v38 = vsel %vm295_vm1, %v496_v36, 0 }
 0x33a   :  { %v494_v39 = vpop.permute.xlu1 %493 }
 0x33b   :  { %v504_v40 = vsel %vm295_vm1, %v494_v39, 0 }
 0x33c   :  { %1650 = vmatpush3.bf16.xpose.msra.mxu1 %v437_v37 }
 0x33d   :  { %1644 = vmatmul.mubr.msk.bf16.vlgmr.msra.gmra.mxu0 %vm295_vm1, %v2185_v5 }
 0x33e   :  { %1656 = vmatpush3.bf16.xpose.msra.mxu0 %v507_v38  ;;  %1659 = vmatprep.mubr.msk.bf16.mxu0 %vm295_vm1, %v2209_v26 }
 0x33f   :  { %1738 = vmatprep.subr.msk.bf16.mxu0 %vm295_vm1, %v494_v39 }
 0x343   :  { %1652 = vmatmul.mubr.msk.bf16.vlgmr.msra.gmra.mxu1 %vm295_vm1, %v2195_v17 }
 0x346   :  { %1658 = vmatpush3.bf16.xpose.msra.mxu0 %v504_v40 }
 0x34d   :  { %1660 = vmatmul.mubr.msk.bf16.vlgmr.msra.gmra.mxu0 %vm295_vm1, %v2203_v22 }
 0x390   :  { %v1637_v42 = vpop.f32.mrf.mxu0 }
 0x391   :  { %v2245_v44 = vadd.f32 %v1637_v42, %v287_v41 }
 0x392   :  { %v342_v45 = vpop.f32.mrf.mxu0 }
 0x393   :  { %v2247_v46 = vadd.f32 %v342_v45, %v285_v43  ;;  %v564_v47 = vsel %vm103_vm0, %v2245_v44, -inf }
 0x394   :  { %565 = vmax.xlane.f32.xlu0 %v564_v47  ;;  %v1638_v49 = vpop.f32.mrf.mxu0 }
 0x395   :  { %v2262_v52 = vadd.f32 %v1638_v49, %v2254_v48  ;;  %v558_v54 = vsel %vm103_vm0, %v2247_v46, -inf }
 0x396   :  { %v345_v51 = vpop.f32.mrf.mxu0 }
 0x397   :  { %v2265_v53 = vadd.f32 %v345_v51, %v2259_v50  ;;  %v567_v56 = vsel %vm103_vm0, %v2262_v52, -inf }
 0x398   :  { %559 = vmax.xlane.f32.xlu0 %v558_v54 }
 0x399   :  { %v561_v55 = vsel %vm103_vm0, %v2265_v53, -inf }
 0x39a   :  { %562 = vmax.xlane.f32.xlu1 %v561_v55 }
 0x39c   :  { %568 = vmax.xlane.f32.xlu0 %v567_v56 }
 0x3fd   :  { %v1645_v57 = vpop.f32.mrf.mxu0 }
 0x3fe   :  { %v2273_v58 = vadd.f32 %v1645_v57, %v287_v41 }
 0x3ff   :  { %v409_v59 = vpop.f32.mrf.mxu0 }
 0x400   :  { %v576_v60 = vsel %vm103_vm0, %v2273_v58, -inf  ;;  %v2284_v6 = vadd.f32 %v409_v59, %v285_v43 }
 0x401   :  { %v1646_v61 = vpop.f32.mrf.mxu0  ;;  %577 = vmax.xlane.f32.xlu0 %v576_v60 }
 0x402   :  { %v2278_v62 = vadd.f32 %v1646_v61, %v2254_v48  ;;  %v570_v16 = vsel %vm103_vm0, %v2284_v6, -inf }
 0x403   :  { %v1653_v1 = vpop.f32.mrf.mxu1  ;;  %v412_v8 = vpop.f32.mrf.mxu0 }
 0x404   :  { %v2280_v2 = vadd.f32 %v1653_v1, %v287_v41  ;;  %v579_v3 = vsel %vm103_vm0, %v2278_v62, -inf  ;;  %v2292_v12 = vadd.f32 %v412_v8, %v2259_v50 }
 0x405   :  { %v476_v4 = vpop.f32.mrf.mxu1  ;;  %580 = vmax.xlane.f32.xlu1 %v579_v3 }
 0x406   :  { %v588_v7 = vsel %vm103_vm0, %v2280_v2, -inf  ;;  %v2294_v14 = vadd.f32 %v476_v4, %v285_v43  ;;  %v573_v23 = vsel %vm103_vm0, %v2292_v12, -inf }
 0x407   :  { %v1654_v10 = vpop.f32.mrf.mxu1  ;;  %589 = vmax.xlane.f32.xlu0 %v588_v7 }
 0x408   :  { %v2289_v11 = vadd.f32 %v1654_v10, %v2254_v48  ;;  %v582_v24 = vsel %vm103_vm0, %v2294_v14, -inf }
 0x409   :  { %v479_v18 = vpop.f32.mrf.mxu1 }
 0x40a   :  { %v591_v15 = vsel %vm103_vm0, %v2289_v11, -inf  ;;  %v2301_v20 = vadd.f32 %v479_v18, %v2259_v50 }
 0x40b   :  { %592 = vmax.xlane.f32.xlu1 %v591_v15  ;;  %571 = vmax.xlane.f32.xlu0 %v570_v16 }
 0x40c   :  { %v585_v28 = vsel %vm103_vm0, %v2301_v20, -inf }
 0x40d   :  { %v1661_v19 = vpop.f32.mrf.mxu0 }
 0x40e   :  { %v2303_v21 = vadd.f32 %v1661_v19, %v287_v41 }
 0x40f   :  { %v543_v25 = vpop.f32.mrf.mxu0  ;;  %574 = vmax.xlane.f32.xlu1 %v573_v23  ;;  %583 = vmax.xlane.f32.xlu0 %v582_v24 }
 0x410   :  { %v2309_v27 = vadd.f32 %v543_v25, %v285_v43  ;;  %v600_v29 = vsel %vm103_vm0, %v2303_v21, -inf }
 0x412   :  { %v594_v30 = vsel %vm103_vm0, %v2309_v27, -inf }
 0x413   :  { %586 = vmax.xlane.f32.xlu1 %v585_v28  ;;  %601 = vmax.xlane.f32.xlu0 %v600_v29 }
 0x417   :  { %595 = vmax.xlane.f32.xlu0 %v594_v30 }
 0x41d   :  { %v566_v31 = vpop.xlane.xlu0 %565 }
 0x41e   :  { %v608_v32 = vsub.f32 %v2245_v44, %v566_v31 }
 0x420   :  { %v626_v34 = vmul.f32 1.442695, %v608_v32 }
 0x421   :  { %v560_v33 = vpop.xlane.xlu0 %559 }
 0x422   :  { %v606_v35 = vsub.f32 %v2247_v46, %v560_v33  ;;  %1837 = vpow2.f32 %v626_v34 }
 0x423   :  { %v563_v44 = vpop.xlane.xlu1 %562 }
 0x424   :  { %805 = vrot.lane.b32.xlu1 %v2185_v5, %s2058_s16  ;;  %v622_v5 = vmul.f32 1.442695, %v606_v35  ;;  %v607_v45 = vsub.f32 %v2265_v53, %v563_v44 }
 0x425   :  { %v569_v42 = vpop.xlane.xlu0 %568 }
 0x426   :  { %1839 = vpow2.f32 %v622_v5  ;;  %v609_v43 = vsub.f32 %v2262_v52, %v569_v42  ;;  %v624_v47 = vmul.f32 1.442695, %v607_v45 }
 0x428   :  { %742 = vrot.lane.b32.xlu1 %v2175_v63, %s2058_s16  ;;  %v1662_v63 = vpop.f32.mrf.mxu0  ;;  %v628_v46 = vmul.f32 1.442695, %v609_v43 }
 0x429   :  { %v2330_v36 = vadd.f32 %v1662_v63, %v2254_v48 }
 0x42a   :  { %1841 = vpow2.f32 %v628_v46 }
 0x42b   :  { %1843 = vpow2.f32 %v624_v47 }
 0x42c   :  { %803 = vrot.lane.b32.xlu1 %v2187_v9, %s2058_s16 }
 0x42d   :  { %744 = vrot.lane.b32.xlu0 %v2179_v0, %s2058_s16  ;;  %v546_v0 = vpop.f32.mrf.mxu0 }
 0x42e   :  { %v2335_v37 = vadd.f32 %v546_v0, %v2259_v50 }
 0x42f   :  { %v2332_v9 = vpop.eup %1837 }
 0x430   :  { %v660_v38 = vsel %vm103_vm0, %v2332_v9, 0.0  ;;  %v597_v40 = vsel %vm103_vm0, %v2335_v37, -inf }
 0x431   :  { %866 = vrot.lane.b32.xlu0 %v2195_v17, %s2058_s16  ;;  %v603_v17 = vsel %vm103_vm0, %v2330_v36, -inf }
 0x433   :  { %v2341_v39 = vpop.eup %1839 }
 0x434   :  { %v654_v41 = vsel %vm103_vm0, %v2341_v39, 0.0 }
 0x437   :  { %v2351_v48 = vpop.eup %1841 }
 0x438   :  { %v663_v49 = vsel %vm103_vm0, %v2351_v48, 0.0  ;;  %v2355_v50 = vpop.eup %1843 }
 0x439   :  { %v657_v52 = vsel %vm103_vm0, %v2355_v50, 0.0 }
 0x450   :  { %604 = vmax.xlane.f32.xlu1 %v603_v17  ;;  %661 = vadd.xlane.f32.xlu0 %v660_v38 }
 0x454   :  { %598 = vmax.xlane.f32.xlu1 %v597_v40  ;;  %655 = vadd.xlane.f32.xlu0 %v654_v41 }
 0x465   :  { %927 = vrot.lane.b32.xlu1 %v2203_v22, %s2058_s16 }
 0x489   :  { %664 = vadd.xlane.f32.xlu1 %v663_v49 }
 0x48a   :  { %v578_v51 = vpop.xlane.xlu0 %577 }
 0x48b   :  { %v612_v22 = vsub.f32 %v2273_v58, %v578_v51 }
 0x48d   :  { %v634_v54 = vmul.f32 1.442695, %v612_v22  ;;  %658 = vadd.xlane.f32.xlu1 %v657_v52 }
 0x48e   :  { %v581_v53 = vpop.xlane.xlu1 %580 }
 0x48f   :  { %1845 = vpow2.f32 %v634_v54  ;;  %v613_v55 = vsub.f32 %v2278_v62, %v581_v53 }
 0x490   :  { %v590_v56 = vpop.xlane.xlu0 %589 }
 0x491   :  { %v636_v57 = vmul.f32 1.442695, %v613_v55  ;;  %v616_v59 = vsub.f32 %v2280_v2, %v590_v56 }
 0x493   :  { %1847 = vpow2.f32 %v636_v57  ;;  %v642_v60 = vmul.f32 1.442695, %v616_v59 }
 0x494   :  { %v593_v61 = vpop.xlane.xlu1 %592  ;;  %v572_v1 = vpop.xlane.xlu0 %571 }
 0x495   :  { %1849 = vpow2.f32 %v642_v60  ;;  %v617_v58 = vsub.f32 %v2289_v11, %v593_v61  ;;  %v610_v3 = vsub.f32 %v2284_v6, %v572_v1 }
 0x497   :  { %v644_v4 = vmul.f32 1.442695, %v617_v58  ;;  %v630_v7 = vmul.f32 1.442695, %v610_v3 }
 0x498   :  { %v575_v8 = vpop.xlane.xlu1 %574  ;;  %v584_v10 = vpop.xlane.xlu0 %583 }
 0x499   :  { %1851 = vpow2.f32 %v644_v4  ;;  %v611_v62 = vsub.f32 %v2292_v12, %v575_v8  ;;  %v614_v15 = vsub.f32 %v2294_v14, %v584_v10 }
 0x49a   :  { %1853 = vpow2.f32 %v630_v7 }
 0x49b   :  { %v632_v2 = vmul.f32 1.442695, %v611_v62  ;;  %v638_v16 = vmul.f32 1.442695, %v614_v15 }
 0x49c   :  { %v2366_v18 = vpop.eup %1845  ;;  %v587_v19 = vpop.xlane.xlu1 %586 }
 0x49d   :  { %v602_v23 = vpop.xlane.xlu0 %601  ;;  %1855 = vpow2.f32 %v632_v2  ;;  %v615_v11 = vsub.f32 %v2301_v20, %v587_v19  ;;  %v672_v24 = vsel %vm103_vm0, %v2366_v18, 0.0 }
 0x49e   :  { %v620_v6 = vsub.f32 %v2303_v21, %v602_v23  ;;  %1857 = vpow2.f32 %v638_v16  ;;  %673 = vadd.xlane.f32.xlu0 %v672_v24 }
 0x49f   :  { %v640_v12 = vmul.f32 1.442695, %v615_v11 }
 0x4a0   :  { %v650_v25 = vmul.f32 1.442695, %v620_v6  ;;  %v2372_v14 = vpop.eup %1847  ;;  %v806_v28 = vpop.permute.xlu1 %805 }
 0x4a1   :  { %v596_v29 = vpop.xlane.xlu0 %595  ;;  %1859 = vpow2.f32 %v640_v12  ;;  %1671 = vmatprep.subr.bf16.mxu0 %v806_v28  ;;  %v675_v20 = vsel %vm103_vm0, %v2372_v14, 0.0 }
 0x4a2   :  { %v618_v30 = vsub.f32 %v2309_v27, %v596_v29  ;;  %v2377_v31 = vpop.eup %1849  ;;  %1861 = vpow2.f32 %v650_v25  ;;  %1672 = vmatpush3.bf16.msra.mxu0 %v806_v28  ;;  %676 = vadd.xlane.f32.xlu1 %v675_v20 }
 0x4a3   :  { %v684_v32 = vsel %vm103_vm0, %v2377_v31, 0.0 }
 0x4a4   :  { %v646_v21 = vmul.f32 1.442695, %v618_v30  ;;  %v743_v33 = vpop.permute.xlu1 %742  ;;  %685 = vadd.xlane.f32.xlu0 %v684_v32 }
 0x4a5   :  { %v745_v34 = vpop.permute.xlu0 %744 }
 0x4a6   :  { %1863 = vpow2.f32 %v646_v21  ;;  %1663 = vmatprep.subr.bf16.mxu1 %v745_v34  ;;  %v2381_v35 = vpop.eup %1851 }
 0x4a7   :  { %1664 = vmatpush3.bf16.msra.mxu1 %v745_v34  ;;  %v2383_v27 = vpop.eup %1853  ;;  %v687_v5 = vsel %vm103_vm0, %v2381_v35, 0.0 }
 0x4a8   :  { %1665 = vmatprep.subr.bf16.mxu1 %v743_v33  ;;  %v804_v63 = vpop.permute.xlu1 %803  ;;  %688 = vadd.xlane.f32.xlu1 %v687_v5  ;;  %v666_v0 = vsel %vm103_vm0, %v2383_v27, 0.0 }
 0x4a9   :  { %667 = vadd.xlane.f32.xlu0 %v666_v0  ;;  %1673 = vmatprep.subr.bf16.mxu0 %v804_v63  ;;  %v867_v38 = vpop.permute.xlu0 %866 }
 0x4aa   :  { %v2389_v17 = vpop.eup %1855  ;;  %1674 = vmatpush3.bf16.msra.mxu0 %v804_v63 }
 0x4ab   :  { %1666 = vmatpush3.bf16.msra.mxu1 %v743_v33  ;;  %v2391_v40 = vpop.eup %1857  ;;  %v669_v41 = vsel %vm103_vm0, %v2389_v17, 0.0 }
 0x4ac   :  { %1679 = vmatprep.subr.bf16.mxu1 %v867_v38  ;;  %670 = vadd.xlane.f32.xlu1 %v669_v41  ;;  %v678_v42 = vsel %vm103_vm0, %v2391_v40, 0.0 }
 0x4ad   :  { %679 = vadd.xlane.f32.xlu0 %v678_v42 }
 0x4ae   :  { %v2397_v43 = vpop.eup %1859 }
 0x4af   :  { %v2399_v44 = vpop.eup %1861  ;;  %v681_v45 = vsel %vm103_vm0, %v2397_v43, 0.0 }
 0x4b0   :  { %682 = vadd.xlane.f32.xlu1 %v681_v45  ;;  %v696_v46 = vsel %vm103_vm0, %v2399_v44, 0.0 }
 0x4b1   :  { %697 = vadd.xlane.f32.xlu0 %v696_v46 }
 0x4b3   :  { %v2405_v47 = vpop.eup %1863 }
 0x4b4   :  { %v690_v49 = vsel %vm103_vm0, %v2405_v47, 0.0 }
 0x4b5   :  { %691 = vadd.xlane.f32.xlu0 %v690_v49 }
 0x4cb   :  { %864 = vrot.lane.b32.xlu0 %v2191_v13, %s2058_s16 }
 0x4d9   :  { %v605_v51 = vpop.xlane.xlu1 %604 }
 0x4da   :  { %v621_v22 = vsub.f32 %v2330_v36, %v605_v51 }
 0x4dc   :  { %v652_v52 = vmul.f32 1.442695, %v621_v22 }
 0x4dd   :  { %v599_v54 = vpop.xlane.xlu1 %598 }
 0x4de   :  { %1865 = vpow2.f32 %v652_v52  ;;  %v619_v53 = vsub.f32 %v2335_v37, %v599_v54  ;;  %v662_v37 = vpop.xlane.xlu0 %661 }
 0x4e0   :  { %v648_v55 = vmul.f32 1.442695, %v619_v53 }
 0x4e1   :  { %v2413_v56 = vpop.permute.xlu1 %927 }
 0x4e2   :  { %1867 = vpow2.f32 %v648_v55  ;;  %1687 = vmatprep.subr.bf16.mxu0 %v2413_v56  ;;  %v656_v60 = vpop.xlane.xlu0 %655 }
 0x4eb   :  { %v2416_v57 = vpop.eup %1865 }
 0x4ec   :  { %v699_v59 = vsel %vm103_vm0, %v2416_v57, 0.0 }
 0x4ed   :  { %700 = vadd.xlane.f32.xlu1 %v699_v59 }
 0x4ef   :  { %v2420_v13 = vpop.eup %1867 }
 0x4f0   :  { %v693_v36 = vsel %vm103_vm0, %v2420_v13, 0.0 }
 0x4f1   :  { %694 = vadd.xlane.f32.xlu1 %v693_v36 }
 0x502   :  { %925 = vrot.lane.b32.xlu1 %v2209_v26, %s2058_s16  ;;  %s2069_s16 = smov 16  }
 0x512   :  { %v665_v61 = vpop.xlane.xlu1 %664 }
 0x513   :  { %1869 = vrcp.f32 %v665_v61 }
 0x514   :  { %1871 = vrcp.f32 %v656_v60 }
 0x515   :  { %1873 = vrcp.f32 %v662_v37 }
 0x516   :  { %v659_v1 = vpop.xlane.xlu1 %658 }
 0x517   :  { %1875 = vrcp.f32 %v659_v1 }
 0x520   :  { %v1870_v58 = vpop.eup %1869 }
 0x521   :  { %v1872_v3 = vpop.eup %1871  ;;  %v709_v8 = vmul.f32 %v1870_v58, %v2351_v48  ;;  %v1817_v58 = vld [vmem:[#allocation5 + $0x8] sm:$0xff]  }
 0x522   :  { %v1874_v4 = vpop.eup %1873  ;;  %v703_v10 = vmul.f32 %v1872_v3, %v2341_v39 }
 0x523   :  { %v707_v26 = vmul.f32 %v1874_v4, %v2332_v9 }
 0x524   :  { %v1876_v7 = vpop.eup %1875 }
 0x525   :  { %v705_v62 = vmul.f32 %v1876_v7, %v2355_v50  ;;  %v735_v2 = vpack.c.bf16 %v709_v8, %v707_v26  ;;  %v1818_v26 = vld [vmem:[#allocation5] sm:$0xff]  }
 0x527   :  { %v734_v15 = vpack.c.bf16 %v705_v62, %v703_v10  ;;  %v674_v16 = vpop.xlane.xlu0 %673 }
 0x529   :  { %1667 = vmatprep.mubr.msk.bf16.mxu1 %vm103_vm0, %v734_v15 }
 0x52a   :  { %1668 = vmatmul.mubr.msk.bf16.vlgmr.msra.gmra.mxu1 %vm103_vm0, %v735_v2 }
 0x52b   :  { %1680 = vmatpush3.bf16.msra.mxu1 %v867_v38  ;;  %v677_v19 = vpop.xlane.xlu1 %676 }
 0x52c   :  { %1877 = vrcp.f32 %v677_v19 }
 0x52d   :  { %v686_v23 = vpop.xlane.xlu0 %685 }
 0x531   :  { %v689_v11 = vpop.xlane.xlu1 %688 }
 0x532   :  { %v668_v6 = vpop.xlane.xlu0 %667 }
 0x533   :  { %1879 = vrcp.f32 %v668_v6 }
 0x534   :  { %1881 = vrcp.f32 %v674_v16 }
 0x535   :  { %v671_v39 = vpop.xlane.xlu1 %670 }
 0x536   :  { %1883 = vrcp.f32 %v671_v39  ;;  %v680_v48 = vpop.xlane.xlu0 %679 }
 0x537   :  { %1885 = vrcp.f32 %v689_v11 }
 0x538   :  { %1887 = vrcp.f32 %v680_v48 }
 0x539   :  { %1889 = vrcp.f32 %v686_v23  ;;  %v683_v9 = vpop.xlane.xlu1 %682  ;;  %v1878_v12 = vpop.eup %1877 }
 0x53a   :  { %1891 = vrcp.f32 %v683_v9  ;;  %v698_v50 = vpop.xlane.xlu0 %697  ;;  %v717_v20 = vmul.f32 %v1878_v12, %v2372_v14 }
 0x53e   :  { %v692_v24 = vpop.xlane.xlu0 %691 }
 0x540   :  { %v1880_v25 = vpop.eup %1879 }
 0x541   :  { %v1882_v28 = vpop.eup %1881  ;;  %v711_v32 = vmul.f32 %v1880_v25, %v2383_v27 }
 0x542   :  { %v865_v29 = vpop.permute.xlu0 %864  ;;  %v715_v5 = vmul.f32 %v1882_v28, %v2366_v18 }
 0x543   :  { %v1884_v30 = vpop.eup %1883  ;;  %1681 = vmatprep.subr.bf16.mxu1 %v865_v29 }
 0x544   :  { %v1886_v21 = vpop.eup %1885  ;;  %1682 = vmatpush3.bf16.msra.mxu1 %v865_v29  ;;  %v713_v33 = vmul.f32 %v1884_v30, %v2389_v17  ;;  %v737_v41 = vpack.c.bf16 %v717_v20, %v715_v5 }
 0x545   :  { %v1888_v34 = vpop.eup %1887  ;;  %v725_v42 = vmul.f32 %v1886_v21, %v2381_v35  ;;  %1695 = vmatprep.subr.bf16.mxu1 %v1817_v58 }
 0x546   :  { %v1890_v63 = vpop.eup %1889  ;;  %v736_v0 = vpack.c.bf16 %v713_v33, %v711_v32  ;;  %v719_v45 = vmul.f32 %v1888_v34, %v2391_v40 }
 0x547   :  { %v1892_v38 = vpop.eup %1891  ;;  %v723_v27 = vmul.f32 %v1890_v63, %v2377_v31 }
 0x548   :  { %1675 = vmatprep.mubr.msk.bf16.mxu0 %vm103_vm0, %v736_v0  ;;  %v721_v14 = vmul.f32 %v1892_v38, %v2397_v43 }
 0x549   :  { %1676 = vmatmul.mubr.msk.bf16.vlgmr.msra.gmra.mxu0 %vm103_vm0, %v737_v41  ;;  %v739_v18 = vpack.c.bf16 %v725_v42, %v723_v27 }
 0x54a   :  { %1688 = vmatpush3.bf16.msra.mxu0 %v2413_v56  ;;  %v738_v17 = vpack.c.bf16 %v721_v14, %v719_v45 }
 0x54c   :  { %1683 = vmatprep.mubr.msk.bf16.mxu1 %vm103_vm0, %v738_v17 }
 0x54d   :  { %1684 = vmatmul.mubr.msk.bf16.vlgmr.msra.gmra.mxu1 %vm103_vm0, %v739_v18 }
 0x54e   :  { %1696 = vmatpush3.bf16.msra.mxu1 %v1817_v58  ;;  %v1927_v58 = vld [vmem:[%s2576_s0 + $0x8] sm:$0xff] }
 0x54f   :  { %1697 = vmatprep.subr.bf16.mxu1 %v1818_v26 }
 0x552   :  { %1698 = vmatpush3.bf16.msra.mxu1 %v1818_v26 }
 0x576   :  { %v701_v46 = vpop.xlane.xlu1 %700 }
 0x577   :  { %1893 = vrcp.f32 %v701_v46 }
 0x578   :  { %1895 = vrcp.f32 %v692_v24 }
 0x579   :  { %1897 = vrcp.f32 %v698_v50 }
 0x57a   :  { %v695_v35 = vpop.xlane.xlu1 %694 }
 0x57b   :  { %1899 = vrcp.f32 %v695_v35 }
 0x57e   :  { %v926_v40 = vpop.permute.xlu1 %925 }
 0x57f   :  { %1689 = vmatprep.subr.bf16.mxu0 %v926_v40 }
 0x580   :  { %1690 = vmatpush3.bf16.msra.mxu0 %v926_v40 }
 0x584   :  { %v1894_v43 = vpop.eup %1893 }
 0x585   :  { %v1896_v49 = vpop.eup %1895  ;;  %v733_v22 = vmul.f32 %v1894_v43, %v2416_v57 }
 0x586   :  { %v1898_v31 = vpop.eup %1897  ;;  %v727_v52 = vmul.f32 %v1896_v49, %v2405_v47 }
 0x587   :  { %v731_v53 = vmul.f32 %v1898_v31, %v2399_v44 }
 0x588   :  { %v1900_v51 = vpop.eup %1899 }
 0x589   :  { %v729_v54 = vmul.f32 %v1900_v51, %v2420_v13  ;;  %v741_v56 = vpack.c.bf16 %v733_v22, %v731_v53  ;;  %v1542_v51 = vld [vmem:[#allocation7] ss:$0 sm:$0xff] }
 0x58b   :  { %v740_v55 = vpack.c.bf16 %v729_v54, %v727_v52 }
 0x58d   :  { %1691 = vmatprep.mubr.msk.bf16.mxu0 %vm103_vm0, %v740_v55  ;;  %v1925_v55 = vld [vmem:[%s2576_s0] sm:$0xff] }
 0x58e   :  { %1692 = vmatmul.mubr.msk.bf16.vlgmr.msra.gmra.mxu0 %vm103_vm0, %v741_v56 }
 0x5ea   :  { %v1669_v59 = vpop.f32.mrf.mxu1 }
 0x5ec   :  { %v788_v36 = vpop.f32.mrf.mxu1 }
 0x5ee   :  { %v1670_v37 = vpop.f32.mrf.mxu1 }
 0x5f0   :  { %v791_v61 = vpop.f32.mrf.mxu1 }
 0x609   :  { %v1677_v60 = vpop.f32.mrf.mxu0 }
 0x60b   :  { %v849_v1 = vpop.f32.mrf.mxu0 }
 0x60d   :  { %v1678_v57 = vpop.f32.mrf.mxu0  ;;  %v1685_v3 = vpop.f32.mrf.mxu1 }
 0x60e   :  { %v1785_v47 = vpack.i.bf16 %v1678_v57, %v1677_v60 }
 0x60f   :  { %v852_v13 = vpop.f32.mrf.mxu0  ;;  %v910_v44 = vpop.f32.mrf.mxu1 }
 0x610   :  { %v1795_v4 = vpack.i.bf16 %v852_v13, %v849_v1  ;;  %1786 = vrot.lane.b32.xlu1 %v1785_v47, %s2068_s3 }
 0x611   :  { %v1686_v7 = vpop.f32.mrf.mxu1 }
 0x612   :  { %v1790_v8 = vpack.i.bf16 %v1686_v7, %v1685_v3  ;;  %1796 = vrot.lane.b32.xlu0 %v1795_v4, %s2068_s3  ;;  %v1928_v3 = vld [vmem:[%s2576_s0 + $0x18] sm:$0xff] }
 0x613   :  { %v913_v10 = vpop.f32.mrf.mxu1 }
 0x614   :  { %v1800_v62 = vpack.i.bf16 %v913_v10, %v910_v44  ;;  %1791 = vrot.lane.b32.xlu1 %v1790_v8, %s2069_s16 }
 0x616   :  { %1801 = vrot.lane.b32.xlu0 %v1800_v62, %s2069_s16  ;;  %s2071_s16 = smov [#allocation11]  }
 0x64e   :  { %v1693_v15 = vpop.f32.mrf.mxu0 }
 0x650   :  { %v971_v2 = vpop.f32.mrf.mxu0 }
 0x652   :  { %v1694_v16 = vpop.f32.mrf.mxu0 }
 0x653   :  { %v1810_v19 = vpack.i.bf16 %v1694_v16, %v1693_v15 }
 0x654   :  { %v974_v23 = vpop.f32.mrf.mxu0 }
 0x655   :  { %v1805_v11 = vpack.i.bf16 %v974_v23, %v971_v2  ;;  %1811 = vrot.lane.b32.xlu1 %v1810_v19, %s2070_s20 }
 0x657   :  { %1806 = vrot.lane.b32.xlu0 %v1805_v11, %s2070_s20  ;;  %s1507_s20 = sshll.u32 %s2071_s16, 4  ;;  %s1508_s20 = int_to_ptr.vmem [resolvable:$true] %s1507_s20 }
 0x658   :  { %p2034_p12 = scmp.lt.s32.totalorder %s1508_s20, %s1508_s20 }
 0x682   :  { %v1787_v6 = vpop.permute.xlu1 %1786 }
 0x683   :  { %v1789_v50 = vunpack.i.h.bf16 %v1787_v6  ;;  %v1788_v24 = vunpack.i.l.bf16 %v1787_v6 }
 0x684   :  { %v1797_v39 = vpop.permute.xlu0 %1796 }
 0x685   :  { %v1799_v12 = vunpack.i.h.bf16 %v1797_v39  ;;  %v1798_v25 = vunpack.i.l.bf16 %v1797_v39  ;;  %v1037_v34 = vsel %vm295_vm1, %v1670_v37, %v1789_v50  ;;  %v1036_v5 = vsel %vm295_vm1, %v1669_v59, %v1788_v24 }
 0x686   :  { %v1792_v48 = vpop.permute.xlu1 %1791 }
 0x687   :  { %v1794_v28 = vunpack.i.h.bf16 %v1792_v48  ;;  %v1793_v29 = vunpack.i.l.bf16 %v1792_v48  ;;  %v1035_v63 = vsel %vm295_vm1, %v791_v61, %v1799_v12  ;;  %v1034_v0 = vsel %vm295_vm1, %v788_v36, %v1798_v25  ;;  %v1926_v36 = vld [vmem:[%s2576_s0 + $0x10] sm:$0xff] }
 0x688   :  { %v1802_v9 = vpop.permute.xlu0 %1801 }
 0x689   :  { %v1804_v30 = vunpack.i.h.bf16 %v1802_v9  ;;  %v1803_v20 = vunpack.i.l.bf16 %v1802_v9  ;;  %v1042_v41 = vsel %vm1038_vm2, %v1037_v34, %v1794_v28  ;;  %v1041_v42 = vsel %vm1038_vm2, %v1036_v5, %v1793_v29  ;;  %v1819_v29 = vld [vmem:[#allocation8 + $0x8] sm:$0xff]  }
 0x68a   :  { %1703 = vmatprep.subr.bf16.mxu0 %v1819_v29 }
 0x68b   :  { %v1039_v27 = vsel %vm1038_vm2, %v1034_v0, %v1803_v20  ;;  %v1040_v17 = vsel %vm1038_vm2, %v1035_v63, %v1804_v30  ;;  %v1820_v30 = vld [vmem:[#allocation8] sm:$0xff]   ;;  %1704 = vmatpush3.bf16.msra.mxu0 %v1819_v29 }
 0x68c   :  { %1705 = vmatprep.subr.bf16.mxu0 %v1820_v30 }
 0x68f   :  { %1706 = vmatpush3.bf16.msra.mxu0 %v1820_v30 }
 0x6c7   :  { %v1812_v21 = vpop.permute.xlu1 %1811 }
 0x6c8   :  { %v1814_v32 = vunpack.i.h.bf16 %v1812_v21  ;;  %v1813_v33 = vunpack.i.l.bf16 %v1812_v21 }
 0x6c9   :  { %v1807_v38 = vpop.permute.xlu0 %1806 }
 0x6ca   :  { %v1809_v45 = vunpack.i.h.bf16 %v1807_v38  ;;  %v1808_v14 = vunpack.i.l.bf16 %v1807_v38  ;;  %v1046_v18 = vsel %vm1043_vm3, %v1041_v42, %v1813_v33  ;;  %v1047_v46 = vsel %vm1043_vm3, %v1042_v41, %v1814_v32 }
 0x6cb   :  { %v1049_v49 = vpack.c.bf16 %v1047_v46, %v1046_v18 }
 0x6cc   :  { %v1044_v35 = vsel %vm1043_vm3, %v1039_v27, %v1808_v14  ;;  %v1045_v40 = vsel %vm1043_vm3, %v1040_v17, %v1809_v45 }
 0x6cd   :  { %v1048_v43 = vpack.c.bf16 %v1045_v40, %v1044_v35 }
 0x6cf   :  { %1699 = vmatprep.mubr.msk.bf16.mxu1 %vm103_vm0, %v1048_v43 }
 0x6d0   :  { %1700 = vmatmul.mubr.msk.bf16.vlgmr.msra.gmra.mxu1 %vm103_vm0, %v1049_v49 }
 0x790   :  { %v1701_v31 = vpop.f32.mrf.mxu1 }
 0x791   :  { %v1122_v52 = vadd.f32 %v1701_v31, %v1542_v51 }
 0x792   :  { %v1113_v22 = vpop.f32.mrf.mxu1 }
 0x793   :  { %v1114_v54 = vadd.f32 %v1542_v51, %v1113_v22  ;;  %v2475_v37 = vadd.f32 %v1926_v36, %v1122_v52  ;;  %v1822_v22 = vld [vmem:[%s2584_s8 + $0x30] sm:$0xff]   ;;  %v1823_v52 = vld [vmem:[%s2584_s8 + $0x28] sm:$0xff]   ;;  %v1828_v36 = vld [vmem:[%s2584_s8] sm:$0xff]  }
 0x794   :  { %v1702_v53 = vpop.f32.mrf.mxu1 }
 0x795   :  { %v2470_v56 = vadd.f32 %v1925_v55, %v1114_v54  ;;  %v1125_v60 = vadd.f32 %v1702_v53, %v1542_v51  ;;  %v1138_v44 = vsel %vm103_vm0, %v2475_v37, 0.0  ;;  %v1824_v54 = vld [vmem:[%s2584_s8 + $0x20] sm:$0xff]   ;;  %v1825_v53 = vld [vmem:[%s2584_s8 + $0x18] sm:$0xff]   ;;  %v1826_v55 = vld [vmem:[%s2584_s8 + $0x10] sm:$0xff]  }
 0x796   :  { %v1116_v59 = vpop.f32.mrf.mxu1 }
 0x797   :  { %v1117_v61 = vadd.f32 %v1542_v51, %v1116_v59  ;;  %v1132_v1 = vsel %vm103_vm0, %v2470_v56, 0.0  ;;  %v2487_v47 = vadd.f32 %v1928_v3, %v1125_v60  ;;  %v1821_v51 = vld [vmem:[%s2584_s8 + $0x38] sm:$0xff]   ;;  %v1827_v59 = vld [vmem:[%s2584_s8 + $0x8] sm:$0xff]   ;;  %v1547_v60 = vld [vmem:[#allocation10] ss:$0 sm:$0xff] }
 0x798   :  { %1133 = vadd.xlane.f32.xlu0 %v1132_v1  ;;  %1711 = vmatprep.subr.bf16.mxu1 %v1821_v51 }
 0x799   :  { %v2482_v57 = vadd.f32 %v1927_v58, %v1117_v61  ;;  %v1141_v4 = vsel %vm103_vm0, %v2487_v47, 0.0  ;;  %1712 = vmatpush3.bf16.msra.mxu1 %v1821_v51 }
 0x79a   :  { %1713 = vmatprep.subr.bf16.mxu1 %v1822_v22 }
 0x79b   :  { %v1135_v13 = vsel %vm103_vm0, %v2482_v57, 0.0 }
 0x79c   :  { %1136 = vadd.xlane.f32.xlu1 %v1135_v13  ;;  %1139 = vadd.xlane.f32.xlu0 %v1138_v44 }
 0x79d   :  { %1714 = vmatpush3.bf16.msra.mxu1 %v1822_v22 }
 0x79e   :  { %1715 = vmatprep.subr.bf16.mxu1 %v1823_v52 }
 0x7a0   :  { %1142 = vadd.xlane.f32.xlu0 %v1141_v4 }
 0x7a1   :  { %1716 = vmatpush3.bf16.msra.mxu1 %v1823_v52 }
 0x7a2   :  { %1717 = vmatprep.subr.bf16.mxu1 %v1824_v54 }
 0x7a5   :  { %1718 = vmatpush3.bf16.msra.mxu1 %v1824_v54 }
 0x7a6   :  { %1719 = vmatprep.subr.bf16.mxu1 %v1825_v53 }
 0x7a9   :  { %1720 = vmatpush3.bf16.msra.mxu1 %v1825_v53 }
 0x7aa   :  { %1721 = vmatprep.subr.bf16.mxu1 %v1826_v55 }
 0x7ad   :  { %1722 = vmatpush3.bf16.msra.mxu1 %v1826_v55 }
 0x7ae   :  { %1723 = vmatprep.subr.bf16.mxu1 %v1827_v59 }
 0x7b1   :  { %1724 = vmatpush3.bf16.msra.mxu1 %v1827_v59 }
 0x7b2   :  { %1725 = vmatprep.subr.bf16.mxu1 %v1828_v36 }
 0x7b5   :  { %1726 = vmatpush3.bf16.msra.mxu1 %v1828_v36 }
 0x821   :  { %v1134_v7 = vpop.xlane.xlu0 %1133 }
 0x822   :  { %v1144_v8 = vmul.f32 0.03125, %v1134_v7 }
 0x824   :  { %v1148_v10 = vsub.f32 %v2470_v56, %v1144_v8 }
 0x825   :  { %v1137_v62 = vpop.xlane.xlu1 %1136  ;;  %v1140_v26 = vpop.xlane.xlu0 %1139 }
 0x826   :  { %v1145_v15 = vmul.f32 0.03125, %v1137_v62  ;;  %v1146_v2 = vmul.f32 0.03125, %v1140_v26  ;;  %v1152_v16 = vmul.f32 %v1148_v10, %v1148_v10 }
 0x828   :  { %v1149_v19 = vsub.f32 %v2482_v57, %v1145_v15  ;;  %v1150_v23 = vsub.f32 %v2475_v37, %v1146_v2  ;;  %v1156_v11 = vsel %vm103_vm0, %v1152_v16, 0.0 }
 0x829   :  { %1157 = vadd.xlane.f32.xlu0 %v1156_v11  ;;  %v1143_v6 = vpop.xlane.xlu0 %1142 }
 0x82a   :  { %v1147_v39 = vmul.f32 0.03125, %v1143_v6  ;;  %v1153_v48 = vmul.f32 %v1149_v19, %v1149_v19  ;;  %v1154_v9 = vmul.f32 %v1150_v23, %v1150_v23 }
 0x82c   :  { %v1151_v50 = vsub.f32 %v2487_v47, %v1147_v39  ;;  %v1159_v24 = vsel %vm103_vm0, %v1153_v48, 0.0  ;;  %v1162_v12 = vsel %vm103_vm0, %v1154_v9, 0.0 }
 0x82d   :  { %1160 = vadd.xlane.f32.xlu1 %v1159_v24  ;;  %1163 = vadd.xlane.f32.xlu0 %v1162_v12 }
 0x82e   :  { %v1155_v25 = vmul.f32 %v1151_v50, %v1151_v50 }
 0x830   :  { %v1165_v28 = vsel %vm103_vm0, %v1155_v25, 0.0 }
 0x831   :  { %1166 = vadd.xlane.f32.xlu1 %v1165_v28 }
 0x8b2   :  { %v1158_v20 = vpop.xlane.xlu0 %1157 }
 0x8b3   :  { %v1168_v21 = vmul.f32 0.03125, %v1158_v20 }
 0x8b5   :  { %v1172_v32 = vadd.f32 1e-05, %v1168_v21 }
 0x8b6   :  { %v1161_v33 = vpop.xlane.xlu1 %1160  ;;  %v1164_v34 = vpop.xlane.xlu0 %1163 }
 0x8b7   :  { %v1169_v5 = vmul.f32 0.03125, %v1161_v33  ;;  %v1170_v63 = vmul.f32 0.03125, %v1164_v34  ;;  %1901 = vrsqrt.f32 %v1172_v32 }
 0x8b9   :  { %v1173_v0 = vadd.f32 1e-05, %v1169_v5  ;;  %v1174_v38 = vadd.f32 1e-05, %v1170_v63 }
 0x8ba   :  { %v1167_v41 = vpop.xlane.xlu1 %1166 }
 0x8bb   :  { %1903 = vrsqrt.f32 %v1173_v0  ;;  %v1171_v42 = vmul.f32 0.03125, %v1167_v41 }
 0x8bc   :  { %1905 = vrsqrt.f32 %v1174_v38 }
 0x8bd   :  { %v1175_v45 = vadd.f32 1e-05, %v1171_v42 }
 0x8bf   :  { %1907 = vrsqrt.f32 %v1175_v45 }
 0x8c4   :  { %v1902_v14 = vpop.eup %1901 }
 0x8c5   :  { %v1180_v17 = vmul.f32 %v1902_v14, %v1148_v10 }
 0x8c8   :  { %v1904_v27 = vpop.eup %1903 }
 0x8c9   :  { %v1181_v18 = vmul.f32 %v1904_v27, %v1149_v19  ;;  %v1906_v46 = vpop.eup %1905 }
 0x8ca   :  { %v1182_v43 = vmul.f32 %v1906_v46, %v1150_v23 }
 0x8cb   :  { %v1184_v35 = vpack.c.bf16 %v1181_v18, %v1180_v17 }
 0x8cc   :  { %v1908_v40 = vpop.eup %1907 }
 0x8cd   :  { %1707 = vmatprep.mubr.msk.bf16.mxu0 %vm103_vm0, %v1184_v35  ;;  %v1183_v49 = vmul.f32 %v1908_v40, %v1151_v50 }
 0x8cf   :  { %v1185_v31 = vpack.c.bf16 %v1183_v49, %v1182_v43 }
 0x8d1   :  { %1708 = vmatmul.mubr.msk.bf16.vlgmr.msra.gmra.mxu0 %vm103_vm0, %v1185_v31 }
 0x991   :  { %v1709_v61 = vpop.f32.mrf.mxu0 }
 0x992   :  { %v2529_v1 = vadd.f32 %v1709_v61, %v1547_v60 }
 0x993   :  { %v1249_v58 = vpop.f32.mrf.mxu0 }
 0x994   :  { %v2532_v3 = vmul.f32 0.70710677, %v2529_v1  ;;  %v2534_v13 = vadd.f32 %v1547_v60, %v1249_v58 }
 0x995   :  { %v1710_v44 = vpop.f32.mrf.mxu0 }
 0x996   :  { %v1270_v4 = vand.u32 2147483647, %v2532_v3  ;;  %v2538_v7 = vmul.f32 0.70710677, %v2534_v13  ;;  %v2540_v8 = vadd.f32 %v1710_v44, %v1547_v60  ;;  %vm1350_vm5 = vcmp.ge.f32.partialorder %v2532_v3, 0.0 }
 0x997   :  { %v1252_v10 = vpop.f32.mrf.mxu0 }
 0x998   :  { %v1274_v62 = vmul.f32 0.3275911, %v1270_v4  ;;  %v1268_v26 = vand.u32 2147483647, %v2538_v7  ;;  %v2544_v15 = vmul.f32 0.70710677, %v2540_v8  ;;  %v2546_v2 = vadd.f32 %v1547_v60, %v1252_v10 }
 0x999   :  { %v1326_v12 = vsub.f32 0.0, %v1270_v4  ;;  %vm1348_vm4 = vcmp.ge.f32.partialorder %v2538_v7, 0.0  ;;  %v1360_v7 = vmul.f32 0.5, %v2534_v13 }
 0x99a   :  { %v1278_v16 = vadd.f32 1.0, %v1274_v62  ;;  %v1272_v19 = vmul.f32 0.3275911, %v1268_v26  ;;  %v1271_v23 = vand.u32 2147483647, %v2544_v15  ;;  %v1324_v25 = vsub.f32 0.0, %v1268_v26 }
 0x99b   :  { %v2550_v11 = vmul.f32 0.70710677, %v2546_v2  ;;  %v1330_v28 = vmul.f32 %v1326_v12, %v1270_v4  ;;  %vm1351_vm6 = vcmp.ge.f32.partialorder %v2544_v15, 0.0 }
 0x99c   :  { %1909 = vrcp.f32 %v1278_v16  ;;  %v1276_v6 = vadd.f32 1.0, %v1272_v19  ;;  %v1275_v39 = vmul.f32 0.3275911, %v1271_v23  ;;  %v1327_v29 = vsub.f32 0.0, %v1271_v23 }
 0x99d   :  { %v1269_v48 = vand.u32 2147483647, %v2550_v11  ;;  %v1328_v20 = vmul.f32 %v1324_v25, %v1268_v26  ;;  %v1336_v32 = vmul.f32 1.442695, %v1330_v28  ;;  %vm1349_vm7 = vcmp.ge.f32.partialorder %v2550_v11, 0.0 }
 0x99e   :  { %1911 = vrcp.f32 %v1276_v6  ;;  %v1279_v9 = vadd.f32 1.0, %v1275_v39  ;;  %v1331_v34 = vmul.f32 %v1327_v29, %v1271_v23 }
 0x99f   :  { %v1273_v50 = vmul.f32 0.3275911, %v1269_v48  ;;  %v1325_v33 = vsub.f32 0.0, %v1269_v48  ;;  %v1332_v38 = vmul.f32 1.442695, %v1328_v20 }
 0x9a0   :  { %1913 = vrcp.f32 %v1279_v9  ;;  %v1338_v17 = vmul.f32 1.442695, %v1331_v34 }
 0x9a1   :  { %v1277_v24 = vadd.f32 1.0, %v1273_v50  ;;  %v1329_v45 = vmul.f32 %v1325_v33, %v1269_v48 }
 0x9a3   :  { %1915 = vrcp.f32 %v1277_v24  ;;  %v1334_v31 = vmul.f32 1.442695, %v1329_v45 }
 0x9a4   :  { %1917 = vpow2.f32 %v1336_v32 }
 0x9a5   :  { %1919 = vpow2.f32 %v1332_v38 }
 0x9a6   :  { %1921 = vpow2.f32 %v1338_v17 }
 0x9a7   :  { %1923 = vpow2.f32 %v1334_v31 }
 0x9a9   :  { %v1910_v30 = vpop.eup %1909 }
 0x9aa   :  { %v1290_v21 = vmul.f32 1.0614054, %v1910_v30 }
 0x9ab   :  { %v1912_v5 = vpop.eup %1911 }
 0x9ac   :  { %v1554_v63 = vadd.f32 -1.4531521, %v1290_v21  ;;  %v1288_v0 = vmul.f32 1.0614054, %v1912_v5 }
 0x9ad   :  { %v1914_v41 = vpop.eup %1913 }
 0x9ae   :  { %v1298_v42 = vmul.f32 %v1910_v30, %v1554_v63  ;;  %v1552_v14 = vadd.f32 -1.4531521, %v1288_v0  ;;  %v1291_v27 = vmul.f32 1.0614054, %v1914_v41 }
 0x9b0   :  { %v1302_v18 = vadd.f32 1.4214138, %v1298_v42  ;;  %v1916_v46 = vpop.eup %1915  ;;  %v1296_v35 = vmul.f32 %v1912_v5, %v1552_v14  ;;  %v1555_v40 = vadd.f32 -1.4531521, %v1291_v27 }
 0x9b1   :  { %v1289_v49 = vmul.f32 1.0614054, %v1916_v46  ;;  %v1918_v16 = vpop.eup %1917 }
 0x9b2   :  { %v1306_v43 = vmul.f32 %v1910_v30, %v1302_v18  ;;  %v1300_v51 = vadd.f32 1.4214138, %v1296_v35  ;;  %v1299_v22 = vmul.f32 %v1914_v41, %v1555_v40  ;;  %v1920_v50 = vpop.eup %1919  ;;  %v1363_v35 = vmul.f32 0.5, %v2540_v8  ;;  %v1560_v8 = vld [vmem:[%s2585_s9] ss:$0 sm:$0xff]  ;;  %s2029_s9 = scalar_lea.vmem %s1508_s20, 512 }
 0x9b3   :  { %v1553_v54 = vadd.f32 -1.4531521, %v1289_v49  ;;  %v1922_v29 = vpop.eup %1921  ;;  %v1362_v49 = vmul.f32 0.5, %v2529_v1  ;;  %p2030_p11 = scmp.ne.s32.totalorder %s1508_s20, %s2029_s9  ;;  %p2035_p13 = scmp.lt.s32.totalorder %s2029_s9, %s2029_s9 }
 0x9b4   :  { %v1558_v52 = vadd.f32 -0.28449672, %v1306_v43  ;;  %v1304_v53 = vmul.f32 %v1912_v5, %v1300_v51  ;;  %v1303_v55 = vadd.f32 1.4214138, %v1299_v22  ;;  %v1924_v34 = vpop.eup %1923  ;;  %v1361_v43 = vmul.f32 0.5, %v2546_v2 }
 0x9b5   :  { %v1297_v36 = vmul.f32 %v1916_v46, %v1553_v54  ;;  %p2036_p0 = por %p2035_p13, %p2034_p12 }
 0x9b6   :  { %v1314_v59 = vmul.f32 %v1910_v30, %v1558_v52  ;;  %v1556_v60 = vadd.f32 -0.28449672, %v1304_v53  ;;  %v1307_v61 = vmul.f32 %v1914_v41, %v1303_v55 }
 0x9b7   :  { %v1301_v44 = vadd.f32 1.4214138, %v1297_v36  ;;  %p2037_p1 = pnand %p2036_p0, %p2030_p11 }
 0x9b8   :  { %v1318_v58 = vadd.f32 0.2548296, %v1314_v59  ;;  %v1312_v4 = vmul.f32 %v1912_v5, %v1556_v60  ;;  %v1559_v10 = vadd.f32 -0.28449672, %v1307_v61 }
 0x9b9   :  { %v1305_v26 = vmul.f32 %v1916_v46, %v1301_v44 }
 0x9ba   :  { %v1322_v62 = vmul.f32 %v1910_v30, %v1318_v58  ;;  %v1316_v19 = vadd.f32 0.2548296, %v1312_v4  ;;  %v1315_v23 = vmul.f32 %v1914_v41, %v1559_v10 }
 0x9bb   :  { %v1557_v39 = vadd.f32 -0.28449672, %v1305_v26 }
 0x9bc   :  { %v1342_v6 = vmul.f32 %v1918_v16, %v1322_v62  ;;  %v1320_v48 = vmul.f32 %v1912_v5, %v1316_v19  ;;  %v1319_v9 = vadd.f32 0.2548296, %v1315_v23 }
 0x9bd   :  { %v1313_v24 = vmul.f32 %v1916_v46, %v1557_v39 }
 0x9be   :  { %v1346_v12 = vsub.f32 1.0, %v1342_v6  ;;  %v1340_v25 = vmul.f32 %v1920_v50, %v1320_v48  ;;  %v1323_v28 = vmul.f32 %v1914_v41, %v1319_v9 }
 0x9bf   :  { %v1317_v20 = vadd.f32 0.2548296, %v1313_v24 }
 0x9c0   :  { %v1344_v21 = vsub.f32 1.0, %v1340_v25  ;;  %v1343_v32 = vmul.f32 %v1922_v29, %v1323_v28  ;;  %v1354_v30 = vsub.f32 0.0, %v1346_v12 }
 0x9c1   :  { %v1321_v33 = vmul.f32 %v1916_v46, %v1317_v20 }
 0x9c2   :  { %v1352_v63 = vsub.f32 0.0, %v1344_v21  ;;  %v1347_v0 = vsub.f32 1.0, %v1343_v32  ;;  %v1358_v41 = vsel %vm1350_vm5, %v1346_v12, %v1354_v30 }
 0x9c3   :  { %v1341_v38 = vmul.f32 %v1924_v34, %v1321_v33  ;;  %v1366_v46 = vadd.f32 1.0, %v1358_v41 }
 0x9c4   :  { %v1355_v42 = vsub.f32 0.0, %v1347_v0  ;;  %v1356_v5 = vsel %vm1348_vm4, %v1344_v21, %v1352_v63 }
 0x9c5   :  { %v1345_v45 = vsub.f32 1.0, %v1341_v38  ;;  %v1364_v18 = vadd.f32 1.0, %v1356_v5  ;;  %v1370_v22 = vmul.f32 %v1366_v46, %v1362_v49 }
 0x9c6   :  { %v1359_v14 = vsel %vm1351_vm6, %v1347_v0, %v1355_v42 }
 0x9c7   :  { %v1367_v27 = vadd.f32 1.0, %v1359_v14  ;;  %v1353_v17 = vsub.f32 0.0, %v1345_v45  ;;  %v1368_v31 = vmul.f32 %v1364_v18, %v1360_v7 }
 0x9c9   :  { %v1357_v40 = vsel %vm1349_vm7, %v1345_v45, %v1353_v17  ;;  %v1371_v15 = vmul.f32 %v1367_v27, %v1363_v35 }
 0x9ca   :  { %v1365_v3 = vadd.f32 1.0, %v1357_v40 }
 0x9cb   :  { %v1373_v54 = vpack.c.bf16 %v1371_v15, %v1370_v22 }
 0x9cc   :  { %v1369_v51 = vmul.f32 %v1365_v3, %v1361_v43 }
 0x9ce   :  { %v1372_v52 = vpack.c.bf16 %v1369_v51, %v1368_v31 }
 0x9d0   :  { %1727 = vmatprep.mubr.bf16.mxu1 %v1372_v52 }
 0x9d1   :  { %1728 = vmatmul.mubr.bf16.vlgmr.msra.gmra.mxu1 %v1373_v54 }
 0xa91   :  { %v1729_v11 = vpop.f32.mrf.mxu1 }
 0xa92   :  { %v1488_v53 = vadd.f32 %v1729_v11, %v1560_v8 }
 0xa93   :  { %v1479_v13 = vpop.f32.mrf.mxu1 }
 0xa94   :  { %v1496_v2 = vadd.f32 %v1488_v53, %v2475_v37  ;;  %v1480_v55 = vadd.f32 %v1560_v8, %v1479_v13 }
 0xa95   :  { %v1730_v59 = vpop.f32.mrf.mxu1 }
 0xa96   :  { %1500 = vst.msk [vmem:[#allocation11 + $0x10] sm:$0xff] %vm103_vm0, %v1496_v2  ;;  %v1494_v1 = vadd.f32 %v1480_v55, %v2470_v56  ;;  %v1491_v36 = vadd.f32 %v1730_v59, %v1560_v8 }
 0xa97   :  { %v1482_v60 = vpop.f32.mrf.mxu1 }
 0xa98   :  { %1498 = vst.msk [vmem:[#allocation11] sm:$0xff] %vm103_vm0, %v1494_v1  ;;  %v1497_v61 = vadd.f32 %v1491_v36, %v2487_v47  ;;  %v1483_v58 = vadd.f32 %v1560_v8, %v1482_v60 }
 0xa9a   :  { %1501 = vst.msk [vmem:[#allocation11 + $0x18] sm:$0xff] %vm103_vm0, %v1497_v61  ;;  %v1495_v44 = vadd.f32 %v1483_v58, %v2482_v57 }
 0xa9c   :  { %1499 = vst.msk [vmem:[#allocation11 + $0x8] sm:$0xff] %vm103_vm0, %v1495_v44 }
 0xa9d   :  { %2040 = shalt.err (!%p2037_p1)
}
 0xa9e   :  { %s2072_s5 = smov 128  }
 0xa9f   :  { %1513 = dma.vmem_to_hbm [thread:$0]  %s1508_s20, 512, %s2586_s10, [#allocation4], %s2072_s5, %s2072_s5, %s2068_s3  }
 0xaa0   :  { %2055 = dma.done.wait [#allocation4], 512  }
 0xaa1   :  { %2056 = vsyncadd [#allocation4], 4294966784 }
 0xaa2   :  { %1517 = vsyncpa [#allocation3], 1 }
 0xaa3   :  { %1518 = vsyncpa [#allocation6], 1 }
 0xaa4   :  { %1519 = vsyncpa [#allocation9], 1 }
 0xaa5   :  { %1520 = vsyncpa [#allocation4], 1 }

</bundles_post_ra>
